<compile_context>
chip_gen: v7x
topology: tpu7x:2x2x1
jax: 0.10.0
libtpu: 0.0.40
codegen_flags: <defaults>
</compile_context>

<pallas_src>
import math

import jax
import jax.numpy as jnp
import numpy as np
from jax.experimental import pallas as pl
from jax.experimental.pallas import tpu as pltpu

LN_EPS = 1e-5
_INV_SQRT2 = 1.0 / math.sqrt(2.0)


def _gelu_exact(v):
    # nn.GELU() default = exact erf-based GELU (kept in f32).
    return 0.5 * v * (1.0 + jax.lax.erf(v * _INV_SQRT2))


def _layernorm(v, gamma, beta):
    mu = jnp.mean(v, axis=-1, keepdims=True)
    var = jnp.mean((v - mu) ** 2, axis=-1, keepdims=True)
    return (v - mu) * jax.lax.rsqrt(var + LN_EPS) * gamma + beta


def _make_mixer_kernel(bb, token_dim):
    """Kernel over a (bb*token_dim, hidden_dim) slab of the flattened (B*T, H) input."""
    T = token_dim

    def kernel(x_ref, g1_ref, be1_ref, wt1t_ref, bt1_ref, wt2t_ref, bt2_ref,
               g2_ref, be2_ref, wc1_ref, bc1_ref, wc2_ref, bc2_ref,
               out_ref, s_ref):
        x = x_ref[...].astype(jnp.float32)                       # (bb*T, H)

        # ---- LayerNorm 1 over hidden_dim (f32 statistics) ----
        y = _layernorm(x, g1_ref[...], be1_ref[...])             # (bb*T, H)

        # ---- token-mixing MLP (mixes along the token axis) ----
        # Weights are pre-transposed wrapper-side, so every step is a plain
        # (M,K)x(K,N) MXU matmul: no XLU transposes inside the kernel.
        wt1t = wt1t_ref[...]                                     # (Ti, T)  bf16
        wt2t = wt2t_ref[...]                                     # (T, Ti)  bf16
        b1 = bt1_ref[...]                                        # (Ti, 1)  f32
        b2 = bt2_ref[...]                                        # (T, 1)   f32
        for b in range(bb):                                      # static unroll (bb small)
            r0, r1 = b * T, (b + 1) * T
            y_b = y[r0:r1, :].astype(jnp.bfloat16)               # (T, H)
            h = jnp.dot(wt1t, y_b,
                        preferred_element_type=jnp.float32) + b1     # (Ti, H)
            h = _gelu_exact(h).astype(jnp.bfloat16)              # dropout = identity (eval)
            tok = jnp.dot(wt2t, h,
                          preferred_element_type=jnp.float32) + b2   # (T, H)
            # First residual, kept in scratch for reuse (out = s + z later).
            s_ref[r0:r1, :] = x[r0:r1, :] + tok

        s = s_ref[...]                                           # (bb*T, H) f32

        # ---- LayerNorm 2 + channel-mixing MLP on the whole slab ----
        z = _layernorm(s, g2_ref[...], be2_ref[...]).astype(jnp.bfloat16)
        h2 = jnp.dot(z, wc1_ref[...],
                     preferred_element_type=jnp.float32) + bc1_ref[...]
        h2 = _gelu_exact(h2).astype(jnp.bfloat16)                # dropout = identity (eval)
        zc = jnp.dot(h2, wc2_ref[...],
                     preferred_element_type=jnp.float32) + bc2_ref[...]

        # out = x + y + z  ==  s + zc  (residual reuse, no extra VPU add of x+y).
        out_ref[...] = (s + zc).astype(out_ref.dtype)

    return kernel


def mixer_layer(x, params, *, batch_block=8, single_buffer_weights=True):
    """Pallas forward of MixerLayer (eval mode)."""
    B, T, H = x.shape
    (g1, be1, wt1, bt1, wt2, bt2, g2, be2, wc1, bc1, wc2, bc2) = params
    Ti = wt1.shape[1]
    Hi = wc1.shape[1]

    # Batch block: as many batch elements per grid step as allowed (all of them
    # at these toy sizes).  At realistic sizes pick the largest bb whose VMEM
    # footprint fits (v7x: 64 MiB physical / 32 MiB default scoped).  On v7x
    # with 2 TensorCores, prefer a bb that keeps grid >= 2 when B permits.
    bb = min(batch_block, B)
    while B % bb:
        bb -= 1

    f32, bf16 = jnp.float32, jnp.bfloat16
    # Pre-transposed bf16 token-MLP weights; bf16 channel-MLP weights.
    wt1t = wt1.T.astype(bf16)                        # (Ti, T)
    wt2t = wt2.T.astype(bf16)                        # (T, Ti)
    prepped = (
        g1.reshape(1, H).astype(f32), be1.reshape(1, H).astype(f32),
        wt1t, bt1.reshape(Ti, 1).astype(f32),
        wt2t, bt2.reshape(T, 1).astype(f32),
        g2.reshape(1, H).astype(f32), be2.reshape(1, H).astype(f32),
        wc1.astype(bf16), bc1.reshape(1, Hi).astype(f32),
        wc2.astype(bf16), bc2.reshape(1, H).astype(f32),
    )

    def const_spec(a):
        nd = a.ndim
        if single_buffer_weights:
            # Grid-invariant operands: single-buffered (no pointless 2x VMEM).
            return pl.BlockSpec(a.shape, lambda i, _nd=nd: (0,) * _nd,
                                pipeline_mode=pl.Buffered(1))
        return pl.BlockSpec(a.shape, lambda i, _nd=nd: (0,) * _nd)

    rows = bb * T
    in_specs = [pl.BlockSpec((rows, H), lambda i: (i, 0))] + \
               [const_spec(p) for p in prepped]

    out2d = pl.pallas_call(
        _make_mixer_kernel(bb, T),
        out_shape=jax.ShapeDtypeStruct((B * T, H), x.dtype),
        grid=(B // bb,),
        in_specs=in_specs,
        out_specs=pl.BlockSpec((rows, H), lambda i: (i, 0)),
        scratch_shapes=[pltpu.VMEM((rows, H), jnp.float32)],
        compiler_params=pltpu.CompilerParams(
            dimension_semantics=("parallel",),
            vmem_limit_bytes=32 * 1024 * 1024),
    )(x.reshape(B * T, H), *prepped)
    # TODO(synk): for H < 128 a wrapper-side fold to (B, T*H) would make stores
    # lane-dense, but costs an in-kernel relayout; skipped (moot once H >= 128).
    return out2d.reshape(B, T, H)


def make_params(key, hidden_dim, hidden_inter_dim, token_dim, token_inter_dim):
    ks = jax.random.split(key, 8)
    f32 = jnp.float32
    g1 = jnp.ones((1, hidden_dim), f32)
    be1 = jnp.zeros((1, hidden_dim), f32)
    g2 = jnp.ones((1, hidden_dim), f32)
    be2 = jnp.zeros((1, hidden_dim), f32)
    wt1 = jax.random.normal(ks[0], (token_dim, token_inter_dim), f32) * 0.1
    bt1 = jax.random.normal(ks[1], (1, token_inter_dim), f32) * 0.01
    wt2 = jax.random.normal(ks[2], (token_inter_dim, token_dim), f32) * 0.1
    bt2 = jax.random.normal(ks[3], (1, token_dim), f32) * 0.01
    wc1 = jax.random.normal(ks[4], (hidden_dim, hidden_inter_dim), f32) * 0.1
    bc1 = jax.random.normal(ks[5], (1, hidden_inter_dim), f32) * 0.01
    wc2 = jax.random.normal(ks[6], (hidden_inter_dim, hidden_dim), f32) * 0.1
    bc2 = jax.random.normal(ks[7], (1, hidden_dim), f32) * 0.01
    return (g1, be1, wt1, bt1, wt2, bt2, g2, be2, wc1, bc1, wc2, bc2)


def mixer_layer_ref(x, params, mm_dtype=jnp.float32):
    """Pure-JAX reference identical to the PyTorch forward (eval mode).

    mm_dtype=float32  -> exact f32 reference.
    mm_dtype=bfloat16 -> same matmul-operand precision as the kernel (f32 accum).
    """
    (g1, be1, wt1, bt1, wt2, bt2, g2, be2, wc1, bc1, wc2, bc2) = params

    def mm(a, w):
        return jnp.einsum("...ij,jk->...ik", a.astype(mm_dtype), w.astype(mm_dtype),
                          preferred_element_type=jnp.float32)

    y = _layernorm(x, g1[0], be1[0])
    yt = jnp.swapaxes(y, 1, 2)                            # (B, H, T)
    h = _gelu_exact(mm(yt, wt1) + bt1[0])
    yt = mm(h, wt2) + bt2[0]
    y = jnp.swapaxes(yt, 1, 2)                            # (B, T, H)
    s = x + y
    z = _layernorm(s, g2[0], be2[0])
    h2 = _gelu_exact(mm(z, wc1) + bc1[0])
    z = mm(h2, wc2) + bc2[0]
    return s + z


if __name__ == "__main__":
    B, token_dim, hidden_dim = 2, 8, 32
    token_inter_dim, hidden_inter_dim = 16, 64

    key = jax.random.PRNGKey(0)
    kx, kp = jax.random.split(key)
    x = jax.random.normal(kx, (B, token_dim, hidden_dim), jnp.float32)
    params = make_params(kp, hidden_dim, hidden_inter_dim, token_dim, token_inter_dim)

    try:
        out = jax.block_until_ready(mixer_layer(x, params))
    except Exception:
        # Fallback for jax versions without BlockSpec(pipeline_mode=...); same kernel.
        out = jax.block_until_ready(mixer_layer(x, params, single_buffer_weights=False))

    # Tight check vs. a precision-matched reference (bf16 matmul operands, f32 accum).
    ref_bf16 = jax.block_until_ready(mixer_layer_ref(x, params, mm_dtype=jnp.bfloat16))
    np.testing.assert_allclose(np.asarray(out), np.asarray(ref_bf16), atol=1e-2, rtol=1e-2)

    # Loose check vs. the full-f32 (PyTorch-equivalent) reference: bounds bf16-MXU error.
    ref_f32 = jax.block_until_ready(mixer_layer_ref(x, params, mm_dtype=jnp.float32))
    np.testing.assert_allclose(np.asarray(out), np.asarray(ref_f32), atol=5e-2, rtol=5e-2)

    print("KERNEL_OK")
</pallas_src>

<mosaic_0001>
module attributes {stable_mosaic.version = 11 : i64} {
  func.func @kernel(%arg0: i32, %arg1: memref<16x32xf32, #tpu.memory_space<vmem>>, %arg2: memref<1x32xf32, #tpu.memory_space<vmem>>, %arg3: memref<1x32xf32, #tpu.memory_space<vmem>>, %arg4: memref<16x8xbf16, #tpu.memory_space<vmem>>, %arg5: memref<16x1xf32, #tpu.memory_space<vmem>>, %arg6: memref<8x16xbf16, #tpu.memory_space<vmem>>, %arg7: memref<8x1xf32, #tpu.memory_space<vmem>>, %arg8: memref<1x32xf32, #tpu.memory_space<vmem>>, %arg9: memref<1x32xf32, #tpu.memory_space<vmem>>, %arg10: memref<32x64xbf16, #tpu.memory_space<vmem>>, %arg11: memref<1x64xf32, #tpu.memory_space<vmem>>, %arg12: memref<64x32xbf16, #tpu.memory_space<vmem>>, %arg13: memref<1x32xf32, #tpu.memory_space<vmem>>, %arg14: memref<16x32xf32, #tpu.memory_space<vmem>>, %arg15: memref<16x32xf32, #tpu.memory_space<vmem>>) attributes {dimension_semantics = [#tpu.dimension_semantics<parallel>], iteration_bounds = array<i64: 1>, scalar_prefetch = 0 : i64, scratch_operands = 1 : i64, tpu.core_type = #tpu.core_type<tc>, window_params = [{transform_indices = @transform_0, window_bounds = array<i64: 16, 32>}, {pipeline_mode = #tpu.pipeline_mode<synchronous>, transform_indices = @transform_1, window_bounds = array<i64: 1, 32>}, {pipeline_mode = #tpu.pipeline_mode<synchronous>, transform_indices = @transform_2, window_bounds = array<i64: 1, 32>}, {pipeline_mode = #tpu.pipeline_mode<synchronous>, transform_indices = @transform_3, window_bounds = array<i64: 16, 8>}, {pipeline_mode = #tpu.pipeline_mode<synchronous>, transform_indices = @transform_4, window_bounds = array<i64: 16, 1>}, {pipeline_mode = #tpu.pipeline_mode<synchronous>, transform_indices = @transform_5, window_bounds = array<i64: 8, 16>}, {pipeline_mode = #tpu.pipeline_mode<synchronous>, transform_indices = @transform_6, window_bounds = array<i64: 8, 1>}, {pipeline_mode = #tpu.pipeline_mode<synchronous>, transform_indices = @transform_7, window_bounds = array<i64: 1, 32>}, {pipeline_mode = #tpu.pipeline_mode<synchronous>, transform_indices = @transform_8, window_bounds = array<i64: 1, 32>}, {pipeline_mode = #tpu.pipeline_mode<synchronous>, transform_indices = @transform_9, window_bounds = array<i64: 32, 64>}, {pipeline_mode = #tpu.pipeline_mode<synchronous>, transform_indices = @transform_10, window_bounds = array<i64: 1, 64>}, {pipeline_mode = #tpu.pipeline_mode<synchronous>, transform_indices = @transform_11, window_bounds = array<i64: 64, 32>}, {pipeline_mode = #tpu.pipeline_mode<synchronous>, transform_indices = @transform_12, window_bounds = array<i64: 1, 32>}, {transform_indices = @transform_13, window_bounds = array<i64: 16, 32>}]} {
    %c0 = arith.constant 0 : index
    %c0_0 = arith.constant 0 : index
    %0 = vector.load %arg1[%c0, %c0_0] : memref<16x32xf32, #tpu.memory_space<vmem>>, vector<16x32xf32>
    %c0_1 = arith.constant 0 : index
    %c0_2 = arith.constant 0 : index
    %1 = vector.load %arg2[%c0_1, %c0_2] : memref<1x32xf32, #tpu.memory_space<vmem>>, vector<1x32xf32>
    %c0_3 = arith.constant 0 : index
    %c0_4 = arith.constant 0 : index
    %2 = vector.load %arg3[%c0_3, %c0_4] : memref<1x32xf32, #tpu.memory_space<vmem>>, vector<1x32xf32>
    %cst = arith.constant dense<0.000000e+00> : vector<16xf32>
    %3 = vector.multi_reduction <add>, %0, %cst [1] : vector<16x32xf32> to vector<16xf32>
    %4 = vector.shape_cast %3 : vector<16xf32> to vector<16x1xf32>
    %cst_5 = arith.constant 3.200000e+01 : f32
    %5 = vector.broadcast %cst_5 : f32 to vector<16x1xf32>
    %6 = arith.divf %4, %5 : vector<16x1xf32>
    %7 = vector.broadcast %6 : vector<16x1xf32> to vector<16x32xf32>
    %8 = arith.subf %0, %7 : vector<16x32xf32>
    %9 = arith.mulf %8, %8 : vector<16x32xf32>
    %cst_6 = arith.constant dense<0.000000e+00> : vector<16xf32>
    %10 = vector.multi_reduction <add>, %9, %cst_6 [1] : vector<16x32xf32> to vector<16xf32>
    %11 = vector.shape_cast %10 : vector<16xf32> to vector<16x1xf32>
    %cst_7 = arith.constant 3.200000e+01 : f32
    %12 = vector.broadcast %cst_7 : f32 to vector<16x1xf32>
    %13 = arith.divf %11, %12 : vector<16x1xf32>
    %14 = vector.broadcast %6 : vector<16x1xf32> to vector<16x32xf32>
    %15 = arith.subf %0, %14 : vector<16x32xf32>
    %cst_8 = arith.constant 9.99999974E-6 : f32
    %16 = vector.broadcast %cst_8 : f32 to vector<16x1xf32>
    %17 = arith.addf %13, %16 : vector<16x1xf32>
    %18 = math.rsqrt %17 : vector<16x1xf32>
    %19 = vector.broadcast %18 : vector<16x1xf32> to vector<16x32xf32>
    %20 = arith.mulf %15, %19 : vector<16x32xf32>
    %21 = vector.broadcast %1 : vector<1x32xf32> to vector<16x32xf32>
    %22 = arith.mulf %20, %21 : vector<16x32xf32>
    %23 = vector.broadcast %2 : vector<1x32xf32> to vector<16x32xf32>
    %24 = arith.addf %22, %23 : vector<16x32xf32>
    %c0_9 = arith.constant 0 : index
    %c0_10 = arith.constant 0 : index
    %25 = vector.load %arg4[%c0_9, %c0_10] : memref<16x8xbf16, #tpu.memory_space<vmem>>, vector<16x8xbf16>
    %c0_11 = arith.constant 0 : index
    %c0_12 = arith.constant 0 : index
    %26 = vector.load %arg6[%c0_11, %c0_12] : memref<8x16xbf16, #tpu.memory_space<vmem>>, vector<8x16xbf16>
    %c0_13 = arith.constant 0 : index
    %c0_14 = arith.constant 0 : index
    %27 = vector.load %arg5[%c0_13, %c0_14] : memref<16x1xf32, #tpu.memory_space<vmem>>, vector<16x1xf32>
    %c0_15 = arith.constant 0 : index
    %c0_16 = arith.constant 0 : index
    %28 = vector.load %arg7[%c0_15, %c0_16] : memref<8x1xf32, #tpu.memory_space<vmem>>, vector<8x1xf32>
    %29 = vector.extract_strided_slice %24 {offsets = [0, 0], sizes = [8, 32], strides = [1, 1]} : vector<16x32xf32> to vector<8x32xf32>
    %30 = arith.truncf %29 : vector<8x32xf32> to vector<8x32xbf16>
    %cst_17 = arith.constant dense<0.000000e+00> : vector<16x32xf32>
    %31 = tpu.matmul %25, %30, %cst_17 {dimension_numbers = #tpu.dot_dimension_numbers<[1], [0], [0], [1], [0, 0, 1, 1], [], []>} : vector<16x8xbf16>, vector<8x32xbf16>, vector<16x32xf32> -> vector<16x32xf32>
    %32 = vector.broadcast %27 : vector<16x1xf32> to vector<16x32xf32>
    %33 = arith.addf %31, %32 : vector<16x32xf32>
    %cst_18 = arith.constant 5.000000e-01 : f32
    %34 = vector.broadcast %cst_18 : f32 to vector<16x32xf32>
    %35 = arith.mulf %34, %33 : vector<16x32xf32>
    %cst_19 = arith.constant 0.707106769 : f32
    %36 = vector.broadcast %cst_19 : f32 to vector<16x32xf32>
    %37 = arith.mulf %33, %36 : vector<16x32xf32>
    %38 = math.erf %37 : vector<16x32xf32>
    %cst_20 = arith.constant 1.000000e+00 : f32
    %39 = vector.broadcast %cst_20 : f32 to vector<16x32xf32>
    %40 = arith.addf %39, %38 : vector<16x32xf32>
    %41 = arith.mulf %35, %40 : vector<16x32xf32>
    %42 = arith.truncf %41 : vector<16x32xf32> to vector<16x32xbf16>
    %cst_21 = arith.constant dense<0.000000e+00> : vector<8x32xf32>
    %43 = tpu.matmul %26, %42, %cst_21 {dimension_numbers = #tpu.dot_dimension_numbers<[1], [0], [0], [1], [0, 0, 1, 1], [], []>} : vector<8x16xbf16>, vector<16x32xbf16>, vector<8x32xf32> -> vector<8x32xf32>
    %44 = vector.broadcast %28 : vector<8x1xf32> to vector<8x32xf32>
    %45 = arith.addf %43, %44 : vector<8x32xf32>
    %46 = vector.extract_strided_slice %0 {offsets = [0, 0], sizes = [8, 32], strides = [1, 1]} : vector<16x32xf32> to vector<8x32xf32>
    %47 = arith.addf %46, %45 : vector<8x32xf32>
    %c0_22 = arith.constant 0 : index
    %c0_23 = arith.constant 0 : index
    %48 = vector.load %arg15[%c0_22, %c0_23] : memref<16x32xf32, #tpu.memory_space<vmem>>, vector<8x32xf32>
    tpu.vector_store %arg15[%c0_22, %c0_23], %47 {strides = array<i32>} : memref<16x32xf32, #tpu.memory_space<vmem>>, vector<8x32xf32>,
    %49 = vector.extract_strided_slice %24 {offsets = [8, 0], sizes = [8, 32], strides = [1, 1]} : vector<16x32xf32> to vector<8x32xf32>
    %50 = arith.truncf %49 : vector<8x32xf32> to vector<8x32xbf16>
    %cst_24 = arith.constant dense<0.000000e+00> : vector<16x32xf32>
    %51 = tpu.matmul %25, %50, %cst_24 {dimension_numbers = #tpu.dot_dimension_numbers<[1], [0], [0], [1], [0, 0, 1, 1], [], []>} : vector<16x8xbf16>, vector<8x32xbf16>, vector<16x32xf32> -> vector<16x32xf32>
    %52 = vector.broadcast %27 : vector<16x1xf32> to vector<16x32xf32>
    %53 = arith.addf %51, %52 : vector<16x32xf32>
    %cst_25 = arith.constant 5.000000e-01 : f32
    %54 = vector.broadcast %cst_25 : f32 to vector<16x32xf32>
    %55 = arith.mulf %54, %53 : vector<16x32xf32>
    %cst_26 = arith.constant 0.707106769 : f32
    %56 = vector.broadcast %cst_26 : f32 to vector<16x32xf32>
    %57 = arith.mulf %53, %56 : vector<16x32xf32>
    %58 = math.erf %57 : vector<16x32xf32>
    %cst_27 = arith.constant 1.000000e+00 : f32
    %59 = vector.broadcast %cst_27 : f32 to vector<16x32xf32>
    %60 = arith.addf %59, %58 : vector<16x32xf32>
    %61 = arith.mulf %55, %60 : vector<16x32xf32>
    %62 = arith.truncf %61 : vector<16x32xf32> to vector<16x32xbf16>
    %cst_28 = arith.constant dense<0.000000e+00> : vector<8x32xf32>
    %63 = tpu.matmul %26, %62, %cst_28 {dimension_numbers = #tpu.dot_dimension_numbers<[1], [0], [0], [1], [0, 0, 1, 1], [], []>} : vector<8x16xbf16>, vector<16x32xbf16>, vector<8x32xf32> -> vector<8x32xf32>
    %64 = vector.broadcast %28 : vector<8x1xf32> to vector<8x32xf32>
    %65 = arith.addf %63, %64 : vector<8x32xf32>
    %66 = vector.extract_strided_slice %0 {offsets = [8, 0], sizes = [8, 32], strides = [1, 1]} : vector<16x32xf32> to vector<8x32xf32>
    %67 = arith.addf %66, %65 : vector<8x32xf32>
    %c8 = arith.constant 8 : index
    %c0_29 = arith.constant 0 : index
    %68 = vector.load %arg15[%c8, %c0_29] : memref<16x32xf32, #tpu.memory_space<vmem>>, vector<8x32xf32>
    tpu.vector_store %arg15[%c8, %c0_29], %67 {strides = array<i32>} : memref<16x32xf32, #tpu.memory_space<vmem>>, vector<8x32xf32>,
    %c0_30 = arith.constant 0 : index
    %c0_31 = arith.constant 0 : index
    %69 = vector.load %arg15[%c0_30, %c0_31] : memref<16x32xf32, #tpu.memory_space<vmem>>, vector<16x32xf32>
    %c0_32 = arith.constant 0 : index
    %c0_33 = arith.constant 0 : index
    %70 = vector.load %arg8[%c0_32, %c0_33] : memref<1x32xf32, #tpu.memory_space<vmem>>, vector<1x32xf32>
    %c0_34 = arith.constant 0 : index
    %c0_35 = arith.constant 0 : index
    %71 = vector.load %arg9[%c0_34, %c0_35] : memref<1x32xf32, #tpu.memory_space<vmem>>, vector<1x32xf32>
    %cst_36 = arith.constant dense<0.000000e+00> : vector<16xf32>
    %72 = vector.multi_reduction <add>, %69, %cst_36 [1] : vector<16x32xf32> to vector<16xf32>
    %73 = vector.shape_cast %72 : vector<16xf32> to vector<16x1xf32>
    %cst_37 = arith.constant 3.200000e+01 : f32
    %74 = vector.broadcast %cst_37 : f32 to vector<16x1xf32>
    %75 = arith.divf %73, %74 : vector<16x1xf32>
    %76 = vector.broadcast %75 : vector<16x1xf32> to vector<16x32xf32>
    %77 = arith.subf %69, %76 : vector<16x32xf32>
    %78 = arith.mulf %77, %77 : vector<16x32xf32>
    %cst_38 = arith.constant dense<0.000000e+00> : vector<16xf32>
    %79 = vector.multi_reduction <add>, %78, %cst_38 [1] : vector<16x32xf32> to vector<16xf32>
    %80 = vector.shape_cast %79 : vector<16xf32> to vector<16x1xf32>
    %cst_39 = arith.constant 3.200000e+01 : f32
    %81 = vector.broadcast %cst_39 : f32 to vector<16x1xf32>
    %82 = arith.divf %80, %81 : vector<16x1xf32>
    %83 = vector.broadcast %75 : vector<16x1xf32> to vector<16x32xf32>
    %84 = arith.subf %69, %83 : vector<16x32xf32>
    %cst_40 = arith.constant 9.99999974E-6 : f32
    %85 = vector.broadcast %cst_40 : f32 to vector<16x1xf32>
    %86 = arith.addf %82, %85 : vector<16x1xf32>
    %87 = math.rsqrt %86 : vector<16x1xf32>
    %88 = vector.broadcast %87 : vector<16x1xf32> to vector<16x32xf32>
    %89 = arith.mulf %84, %88 : vector<16x32xf32>
    %90 = vector.broadcast %70 : vector<1x32xf32> to vector<16x32xf32>
    %91 = arith.mulf %89, %90 : vector<16x32xf32>
    %92 = vector.broadcast %71 : vector<1x32xf32> to vector<16x32xf32>
    %93 = arith.addf %91, %92 : vector<16x32xf32>
    %94 = arith.truncf %93 : vector<16x32xf32> to vector<16x32xbf16>
    %c0_41 = arith.constant 0 : index
    %c0_42 = arith.constant 0 : index
    %95 = vector.load %arg10[%c0_41, %c0_42] : memref<32x64xbf16, #tpu.memory_space<vmem>>, vector<32x64xbf16>
    %cst_43 = arith.constant dense<0.000000e+00> : vector<16x64xf32>
    %96 = tpu.matmul %94, %95, %cst_43 {dimension_numbers = #tpu.dot_dimension_numbers<[1], [0], [0], [1], [0, 0, 1, 1], [], []>} : vector<16x32xbf16>, vector<32x64xbf16>, vector<16x64xf32> -> vector<16x64xf32>
    %c0_44 = arith.constant 0 : index
    %c0_45 = arith.constant 0 : index
    %97 = vector.load %arg11[%c0_44, %c0_45] : memref<1x64xf32, #tpu.memory_space<vmem>>, vector<1x64xf32>
    %98 = vector.broadcast %97 : vector<1x64xf32> to vector<16x64xf32>
    %99 = arith.addf %96, %98 : vector<16x64xf32>
    %cst_46 = arith.constant 5.000000e-01 : f32
    %100 = vector.broadcast %cst_46 : f32 to vector<16x64xf32>
    %101 = arith.mulf %100, %99 : vector<16x64xf32>
    %cst_47 = arith.constant 0.707106769 : f32
    %102 = vector.broadcast %cst_47 : f32 to vector<16x64xf32>
    %103 = arith.mulf %99, %102 : vector<16x64xf32>
    %104 = math.erf %103 : vector<16x64xf32>
    %cst_48 = arith.constant 1.000000e+00 : f32
    %105 = vector.broadcast %cst_48 : f32 to vector<16x64xf32>
    %106 = arith.addf %105, %104 : vector<16x64xf32>
    %107 = arith.mulf %101, %106 : vector<16x64xf32>
    %108 = arith.truncf %107 : vector<16x64xf32> to vector<16x64xbf16>
    %c0_49 = arith.constant 0 : index
    %c0_50 = arith.constant 0 : index
    %109 = vector.load %arg12[%c0_49, %c0_50] : memref<64x32xbf16, #tpu.memory_space<vmem>>, vector<64x32xbf16>
    %cst_51 = arith.constant dense<0.000000e+00> : vector<16x32xf32>
    %110 = tpu.matmul %108, %109, %cst_51 {dimension_numbers = #tpu.dot_dimension_numbers<[1], [0], [0], [1], [0, 0, 1, 1], [], []>} : vector<16x64xbf16>, vector<64x32xbf16>, vector<16x32xf32> -> vector<16x32xf32>
    %c0_52 = arith.constant 0 : index
    %c0_53 = arith.constant 0 : index
    %111 = vector.load %arg13[%c0_52, %c0_53] : memref<1x32xf32, #tpu.memory_space<vmem>>, vector<1x32xf32>
    %112 = vector.broadcast %111 : vector<1x32xf32> to vector<16x32xf32>
    %113 = arith.addf %110, %112 : vector<16x32xf32>
    %114 = arith.addf %69, %113 : vector<16x32xf32>
    %c0_54 = arith.constant 0 : index
    %c0_55 = arith.constant 0 : index
    %115 = vector.load %arg14[%c0_54, %c0_55] : memref<16x32xf32, #tpu.memory_space<vmem>>, vector<16x32xf32>
    tpu.vector_store %arg14[%c0_54, %c0_55], %114 {strides = array<i32>} : memref<16x32xf32, #tpu.memory_space<vmem>>, vector<16x32xf32>,
    return
  }
  func.func @transform_0(%arg0: i32) -> (i32, i32) {
    %c0_i32 = arith.constant 0 : i32
    %c0_i32_0 = arith.constant 0 : i32
    return %arg0, %c0_i32 : i32, i32
  }
  func.func @transform_1(%arg0: i32) -> (i32, i32) {
    %c0_i32 = arith.constant 0 : i32
    %c0_i32_0 = arith.constant 0 : i32
    %c0_i32_1 = arith.constant 0 : i32
    return %c0_i32, %c0_i32_0 : i32, i32
  }
  func.func @transform_2(%arg0: i32) -> (i32, i32) {
    %c0_i32 = arith.constant 0 : i32
    %c0_i32_0 = arith.constant 0 : i32
    %c0_i32_1 = arith.constant 0 : i32
    return %c0_i32, %c0_i32_0 : i32, i32
  }
  func.func @transform_3(%arg0: i32) -> (i32, i32) {
    %c0_i32 = arith.constant 0 : i32
    %c0_i32_0 = arith.constant 0 : i32
    %c0_i32_1 = arith.constant 0 : i32
    return %c0_i32, %c0_i32_0 : i32, i32
  }
  func.func @transform_4(%arg0: i32) -> (i32, i32) {
    %c0_i32 = arith.constant 0 : i32
    %c0_i32_0 = arith.constant 0 : i32
    %c0_i32_1 = arith.constant 0 : i32
    return %c0_i32, %c0_i32_0 : i32, i32
  }
  func.func @transform_5(%arg0: i32) -> (i32, i32) {
    %c0_i32 = arith.constant 0 : i32
    %c0_i32_0 = arith.constant 0 : i32
    %c0_i32_1 = arith.constant 0 : i32
    return %c0_i32, %c0_i32_0 : i32, i32
  }
  func.func @transform_6(%arg0: i32) -> (i32, i32) {
    %c0_i32 = arith.constant 0 : i32
    %c0_i32_0 = arith.constant 0 : i32
    %c0_i32_1 = arith.constant 0 : i32
    return %c0_i32, %c0_i32_0 : i32, i32
  }
  func.func @transform_7(%arg0: i32) -> (i32, i32) {
    %c0_i32 = arith.constant 0 : i32
    %c0_i32_0 = arith.constant 0 : i32
    %c0_i32_1 = arith.constant 0 : i32
    return %c0_i32, %c0_i32_0 : i32, i32
  }
  func.func @transform_8(%arg0: i32) -> (i32, i32) {
    %c0_i32 = arith.constant 0 : i32
    %c0_i32_0 = arith.constant 0 : i32
    %c0_i32_1 = arith.constant 0 : i32
    return %c0_i32, %c0_i32_0 : i32, i32
  }
  func.func @transform_9(%arg0: i32) -> (i32, i32) {
    %c0_i32 = arith.constant 0 : i32
    %c0_i32_0 = arith.constant 0 : i32
    %c0_i32_1 = arith.constant 0 : i32
    return %c0_i32, %c0_i32_0 : i32, i32
  }
  func.func @transform_10(%arg0: i32) -> (i32, i32) {
    %c0_i32 = arith.constant 0 : i32
    %c0_i32_0 = arith.constant 0 : i32
    %c0_i32_1 = arith.constant 0 : i32
    return %c0_i32, %c0_i32_0 : i32, i32
  }
  func.func @transform_11(%arg0: i32) -> (i32, i32) {
    %c0_i32 = arith.constant 0 : i32
    %c0_i32_0 = arith.constant 0 : i32
    %c0_i32_1 = arith.constant 0 : i32
    return %c0_i32, %c0_i32_0 : i32, i32
  }
  func.func @transform_12(%arg0: i32) -> (i32, i32) {
    %c0_i32 = arith.constant 0 : i32
    %c0_i32_0 = arith.constant 0 : i32
    %c0_i32_1 = arith.constant 0 : i32
    return %c0_i32, %c0_i32_0 : i32, i32
  }
  func.func @transform_13(%arg0: i32) -> (i32, i32) {
    %c0_i32 = arith.constant 0 : i32
    %c0_i32_0 = arith.constant 0 : i32
    return %arg0, %c0_i32 : i32, i32
  }
}

module attributes {stable_mosaic.version = 11 : i64} {
  func.func @kernel(%arg0: i32, %arg1: memref<16x32xf32, #tpu.memory_space<vmem>>, %arg2: memref<1x32xf32, #tpu.memory_space<vmem>>, %arg3: memref<1x32xf32, #tpu.memory_space<vmem>>, %arg4: memref<16x8xbf16, #tpu.memory_space<vmem>>, %arg5: memref<16x1xf32, #tpu.memory_space<vmem>>, %arg6: memref<8x16xbf16, #tpu.memory_space<vmem>>, %arg7: memref<8x1xf32, #tpu.memory_space<vmem>>, %arg8: memref<1x32xf32, #tpu.memory_space<vmem>>, %arg9: memref<1x32xf32, #tpu.memory_space<vmem>>, %arg10: memref<32x64xbf16, #tpu.memory_space<vmem>>, %arg11: memref<1x64xf32, #tpu.memory_space<vmem>>, %arg12: memref<64x32xbf16, #tpu.memory_space<vmem>>, %arg13: memref<1x32xf32, #tpu.memory_space<vmem>>, %arg14: memref<16x32xf32, #tpu.memory_space<vmem>>, %arg15: memref<16x32xf32, #tpu.memory_space<vmem>>) attributes {dimension_semantics = [#tpu.dimension_semantics<parallel>], iteration_bounds = array<i64: 1>, scalar_prefetch = 0 : i64, scratch_operands = 1 : i64, tpu.core_type = #tpu.core_type<tc>, window_params = [{transform_indices = @transform_0, window_bounds = array<i64: 16, 32>}, {pipeline_mode = #tpu.pipeline_mode<synchronous>, transform_indices = @transform_1, window_bounds = array<i64: 1, 32>}, {pipeline_mode = #tpu.pipeline_mode<synchronous>, transform_indices = @transform_2, window_bounds = array<i64: 1, 32>}, {pipeline_mode = #tpu.pipeline_mode<synchronous>, transform_indices = @transform_3, window_bounds = array<i64: 16, 8>}, {pipeline_mode = #tpu.pipeline_mode<synchronous>, transform_indices = @transform_4, window_bounds = array<i64: 16, 1>}, {pipeline_mode = #tpu.pipeline_mode<synchronous>, transform_indices = @transform_5, window_bounds = array<i64: 8, 16>}, {pipeline_mode = #tpu.pipeline_mode<synchronous>, transform_indices = @transform_6, window_bounds = array<i64: 8, 1>}, {pipeline_mode = #tpu.pipeline_mode<synchronous>, transform_indices = @transform_7, window_bounds = array<i64: 1, 32>}, {pipeline_mode = #tpu.pipeline_mode<synchronous>, transform_indices = @transform_8, window_bounds = array<i64: 1, 32>}, {pipeline_mode = #tpu.pipeline_mode<synchronous>, transform_indices = @transform_9, window_bounds = array<i64: 32, 64>}, {pipeline_mode = #tpu.pipeline_mode<synchronous>, transform_indices = @transform_10, window_bounds = array<i64: 1, 64>}, {pipeline_mode = #tpu.pipeline_mode<synchronous>, transform_indices = @transform_11, window_bounds = array<i64: 64, 32>}, {pipeline_mode = #tpu.pipeline_mode<synchronous>, transform_indices = @transform_12, window_bounds = array<i64: 1, 32>}, {transform_indices = @transform_13, window_bounds = array<i64: 16, 32>}]} {
    %c0 = arith.constant 0 : index
    %c0_0 = arith.constant 0 : index
    %0 = vector.load %arg1[%c0, %c0_0] : memref<16x32xf32, #tpu.memory_space<vmem>>, vector<16x32xf32>
    %c0_1 = arith.constant 0 : index
    %c0_2 = arith.constant 0 : index
    %1 = vector.load %arg2[%c0_1, %c0_2] : memref<1x32xf32, #tpu.memory_space<vmem>>, vector<1x32xf32>
    %c0_3 = arith.constant 0 : index
    %c0_4 = arith.constant 0 : index
    %2 = vector.load %arg3[%c0_3, %c0_4] : memref<1x32xf32, #tpu.memory_space<vmem>>, vector<1x32xf32>
    %cst = arith.constant dense<0.000000e+00> : vector<16xf32>
    %3 = vector.multi_reduction <add>, %0, %cst [1] : vector<16x32xf32> to vector<16xf32>
    %4 = vector.shape_cast %3 : vector<16xf32> to vector<16x1xf32>
    %cst_5 = arith.constant 3.200000e+01 : f32
    %5 = vector.broadcast %cst_5 : f32 to vector<16x1xf32>
    %6 = arith.divf %4, %5 : vector<16x1xf32>
    %7 = vector.broadcast %6 : vector<16x1xf32> to vector<16x32xf32>
    %8 = arith.subf %0, %7 : vector<16x32xf32>
    %9 = arith.mulf %8, %8 : vector<16x32xf32>
    %cst_6 = arith.constant dense<0.000000e+00> : vector<16xf32>
    %10 = vector.multi_reduction <add>, %9, %cst_6 [1] : vector<16x32xf32> to vector<16xf32>
    %11 = vector.shape_cast %10 : vector<16xf32> to vector<16x1xf32>
    %cst_7 = arith.constant 3.200000e+01 : f32
    %12 = vector.broadcast %cst_7 : f32 to vector<16x1xf32>
    %13 = arith.divf %11, %12 : vector<16x1xf32>
    %14 = vector.broadcast %6 : vector<16x1xf32> to vector<16x32xf32>
    %15 = arith.subf %0, %14 : vector<16x32xf32>
    %cst_8 = arith.constant 9.99999974E-6 : f32
    %16 = vector.broadcast %cst_8 : f32 to vector<16x1xf32>
    %17 = arith.addf %13, %16 : vector<16x1xf32>
    %18 = math.rsqrt %17 : vector<16x1xf32>
    %19 = vector.broadcast %18 : vector<16x1xf32> to vector<16x32xf32>
    %20 = arith.mulf %15, %19 : vector<16x32xf32>
    %21 = vector.broadcast %1 : vector<1x32xf32> to vector<16x32xf32>
    %22 = arith.mulf %20, %21 : vector<16x32xf32>
    %23 = vector.broadcast %2 : vector<1x32xf32> to vector<16x32xf32>
    %24 = arith.addf %22, %23 : vector<16x32xf32>
    %c0_9 = arith.constant 0 : index
    %c0_10 = arith.constant 0 : index
    %25 = vector.load %arg4[%c0_9, %c0_10] : memref<16x8xbf16, #tpu.memory_space<vmem>>, vector<16x8xbf16>
    %c0_11 = arith.constant 0 : index
    %c0_12 = arith.constant 0 : index
    %26 = vector.load %arg6[%c0_11, %c0_12] : memref<8x16xbf16, #tpu.memory_space<vmem>>, vector<8x16xbf16>
    %c0_13 = arith.constant 0 : index
    %c0_14 = arith.constant 0 : index
    %27 = vector.load %arg5[%c0_13, %c0_14] : memref<16x1xf32, #tpu.memory_space<vmem>>, vector<16x1xf32>
    %c0_15 = arith.constant 0 : index
    %c0_16 = arith.constant 0 : index
    %28 = vector.load %arg7[%c0_15, %c0_16] : memref<8x1xf32, #tpu.memory_space<vmem>>, vector<8x1xf32>
    %29 = vector.extract_strided_slice %24 {offsets = [0, 0], sizes = [8, 32], strides = [1, 1]} : vector<16x32xf32> to vector<8x32xf32>
    %30 = arith.truncf %29 : vector<8x32xf32> to vector<8x32xbf16>
    %cst_17 = arith.constant dense<0.000000e+00> : vector<16x32xf32>
    %31 = tpu.matmul %25, %30, %cst_17 {dimension_numbers = #tpu.dot_dimension_numbers<[1], [0], [0], [1], [0, 0, 1, 1], [], []>} : vector<16x8xbf16>, vector<8x32xbf16>, vector<16x32xf32> -> vector<16x32xf32>
    %32 = vector.broadcast %27 : vector<16x1xf32> to vector<16x32xf32>
    %33 = arith.addf %31, %32 : vector<16x32xf32>
    %cst_18 = arith.constant 5.000000e-01 : f32
    %34 = vector.broadcast %cst_18 : f32 to vector<16x32xf32>
    %35 = arith.mulf %34, %33 : vector<16x32xf32>
    %cst_19 = arith.constant 0.707106769 : f32
    %36 = vector.broadcast %cst_19 : f32 to vector<16x32xf32>
    %37 = arith.mulf %33, %36 : vector<16x32xf32>
    %38 = math.erf %37 : vector<16x32xf32>
    %cst_20 = arith.constant 1.000000e+00 : f32
    %39 = vector.broadcast %cst_20 : f32 to vector<16x32xf32>
    %40 = arith.addf %39, %38 : vector<16x32xf32>
    %41 = arith.mulf %35, %40 : vector<16x32xf32>
    %42 = arith.truncf %41 : vector<16x32xf32> to vector<16x32xbf16>
    %cst_21 = arith.constant dense<0.000000e+00> : vector<8x32xf32>
    %43 = tpu.matmul %26, %42, %cst_21 {dimension_numbers = #tpu.dot_dimension_numbers<[1], [0], [0], [1], [0, 0, 1, 1], [], []>} : vector<8x16xbf16>, vector<16x32xbf16>, vector<8x32xf32> -> vector<8x32xf32>
    %44 = vector.broadcast %28 : vector<8x1xf32> to vector<8x32xf32>
    %45 = arith.addf %43, %44 : vector<8x32xf32>
    %46 = vector.extract_strided_slice %0 {offsets = [0, 0], sizes = [8, 32], strides = [1, 1]} : vector<16x32xf32> to vector<8x32xf32>
    %47 = arith.addf %46, %45 : vector<8x32xf32>
    %c0_22 = arith.constant 0 : index
    %c0_23 = arith.constant 0 : index
    %48 = vector.load %arg15[%c0_22, %c0_23] : memref<16x32xf32, #tpu.memory_space<vmem>>, vector<8x32xf32>
    tpu.vector_store %arg15[%c0_22, %c0_23], %47 {strides = array<i32>} : memref<16x32xf32, #tpu.memory_space<vmem>>, vector<8x32xf32>,
    %49 = vector.extract_strided_slice %24 {offsets = [8, 0], sizes = [8, 32], strides = [1, 1]} : vector<16x32xf32> to vector<8x32xf32>
    %50 = arith.truncf %49 : vector<8x32xf32> to vector<8x32xbf16>
    %cst_24 = arith.constant dense<0.000000e+00> : vector<16x32xf32>
    %51 = tpu.matmul %25, %50, %cst_24 {dimension_numbers = #tpu.dot_dimension_numbers<[1], [0], [0], [1], [0, 0, 1, 1], [], []>} : vector<16x8xbf16>, vector<8x32xbf16>, vector<16x32xf32> -> vector<16x32xf32>
    %52 = vector.broadcast %27 : vector<16x1xf32> to vector<16x32xf32>
    %53 = arith.addf %51, %52 : vector<16x32xf32>
    %cst_25 = arith.constant 5.000000e-01 : f32
    %54 = vector.broadcast %cst_25 : f32 to vector<16x32xf32>
    %55 = arith.mulf %54, %53 : vector<16x32xf32>
    %cst_26 = arith.constant 0.707106769 : f32
    %56 = vector.broadcast %cst_26 : f32 to vector<16x32xf32>
    %57 = arith.mulf %53, %56 : vector<16x32xf32>
    %58 = math.erf %57 : vector<16x32xf32>
    %cst_27 = arith.constant 1.000000e+00 : f32
    %59 = vector.broadcast %cst_27 : f32 to vector<16x32xf32>
    %60 = arith.addf %59, %58 : vector<16x32xf32>
    %61 = arith.mulf %55, %60 : vector<16x32xf32>
    %62 = arith.truncf %61 : vector<16x32xf32> to vector<16x32xbf16>
    %cst_28 = arith.constant dense<0.000000e+00> : vector<8x32xf32>
    %63 = tpu.matmul %26, %62, %cst_28 {dimension_numbers = #tpu.dot_dimension_numbers<[1], [0], [0], [1], [0, 0, 1, 1], [], []>} : vector<8x16xbf16>, vector<16x32xbf16>, vector<8x32xf32> -> vector<8x32xf32>
    %64 = vector.broadcast %28 : vector<8x1xf32> to vector<8x32xf32>
    %65 = arith.addf %63, %64 : vector<8x32xf32>
    %66 = vector.extract_strided_slice %0 {offsets = [8, 0], sizes = [8, 32], strides = [1, 1]} : vector<16x32xf32> to vector<8x32xf32>
    %67 = arith.addf %66, %65 : vector<8x32xf32>
    %c8 = arith.constant 8 : index
    %c0_29 = arith.constant 0 : index
    %68 = vector.load %arg15[%c8, %c0_29] : memref<16x32xf32, #tpu.memory_space<vmem>>, vector<8x32xf32>
    tpu.vector_store %arg15[%c8, %c0_29], %67 {strides = array<i32>} : memref<16x32xf32, #tpu.memory_space<vmem>>, vector<8x32xf32>,
    %c0_30 = arith.constant 0 : index
    %c0_31 = arith.constant 0 : index
    %69 = vector.load %arg15[%c0_30, %c0_31] : memref<16x32xf32, #tpu.memory_space<vmem>>, vector<16x32xf32>
    %c0_32 = arith.constant 0 : index
    %c0_33 = arith.constant 0 : index
    %70 = vector.load %arg8[%c0_32, %c0_33] : memref<1x32xf32, #tpu.memory_space<vmem>>, vector<1x32xf32>
    %c0_34 = arith.constant 0 : index
    %c0_35 = arith.constant 0 : index
    %71 = vector.load %arg9[%c0_34, %c0_35] : memref<1x32xf32, #tpu.memory_space<vmem>>, vector<1x32xf32>
    %cst_36 = arith.constant dense<0.000000e+00> : vector<16xf32>
    %72 = vector.multi_reduction <add>, %69, %cst_36 [1] : vector<16x32xf32> to vector<16xf32>
    %73 = vector.shape_cast %72 : vector<16xf32> to vector<16x1xf32>
    %cst_37 = arith.constant 3.200000e+01 : f32
    %74 = vector.broadcast %cst_37 : f32 to vector<16x1xf32>
    %75 = arith.divf %73, %74 : vector<16x1xf32>
    %76 = vector.broadcast %75 : vector<16x1xf32> to vector<16x32xf32>
    %77 = arith.subf %69, %76 : vector<16x32xf32>
    %78 = arith.mulf %77, %77 : vector<16x32xf32>
    %cst_38 = arith.constant dense<0.000000e+00> : vector<16xf32>
    %79 = vector.multi_reduction <add>, %78, %cst_38 [1] : vector<16x32xf32> to vector<16xf32>
    %80 = vector.shape_cast %79 : vector<16xf32> to vector<16x1xf32>
    %cst_39 = arith.constant 3.200000e+01 : f32
    %81 = vector.broadcast %cst_39 : f32 to vector<16x1xf32>
    %82 = arith.divf %80, %81 : vector<16x1xf32>
    %83 = vector.broadcast %75 : vector<16x1xf32> to vector<16x32xf32>
    %84 = arith.subf %69, %83 : vector<16x32xf32>
    %cst_40 = arith.constant 9.99999974E-6 : f32
    %85 = vector.broadcast %cst_40 : f32 to vector<16x1xf32>
    %86 = arith.addf %82, %85 : vector<16x1xf32>
    %87 = math.rsqrt %86 : vector<16x1xf32>
    %88 = vector.broadcast %87 : vector<16x1xf32> to vector<16x32xf32>
    %89 = arith.mulf %84, %88 : vector<16x32xf32>
    %90 = vector.broadcast %70 : vector<1x32xf32> to vector<16x32xf32>
    %91 = arith.mulf %89, %90 : vector<16x32xf32>
    %92 = vector.broadcast %71 : vector<1x32xf32> to vector<16x32xf32>
    %93 = arith.addf %91, %92 : vector<16x32xf32>
    %94 = arith.truncf %93 : vector<16x32xf32> to vector<16x32xbf16>
    %c0_41 = arith.constant 0 : index
    %c0_42 = arith.constant 0 : index
    %95 = vector.load %arg10[%c0_41, %c0_42] : memref<32x64xbf16, #tpu.memory_space<vmem>>, vector<32x64xbf16>
    %cst_43 = arith.constant dense<0.000000e+00> : vector<16x64xf32>
    %96 = tpu.matmul %94, %95, %cst_43 {dimension_numbers = #tpu.dot_dimension_numbers<[1], [0], [0], [1], [0, 0, 1, 1], [], []>} : vector<16x32xbf16>, vector<32x64xbf16>, vector<16x64xf32> -> vector<16x64xf32>
    %c0_44 = arith.constant 0 : index
    %c0_45 = arith.constant 0 : index
    %97 = vector.load %arg11[%c0_44, %c0_45] : memref<1x64xf32, #tpu.memory_space<vmem>>, vector<1x64xf32>
    %98 = vector.broadcast %97 : vector<1x64xf32> to vector<16x64xf32>
    %99 = arith.addf %96, %98 : vector<16x64xf32>
    %cst_46 = arith.constant 5.000000e-01 : f32
    %100 = vector.broadcast %cst_46 : f32 to vector<16x64xf32>
    %101 = arith.mulf %100, %99 : vector<16x64xf32>
    %cst_47 = arith.constant 0.707106769 : f32
    %102 = vector.broadcast %cst_47 : f32 to vector<16x64xf32>
    %103 = arith.mulf %99, %102 : vector<16x64xf32>
    %104 = math.erf %103 : vector<16x64xf32>
    %cst_48 = arith.constant 1.000000e+00 : f32
    %105 = vector.broadcast %cst_48 : f32 to vector<16x64xf32>
    %106 = arith.addf %105, %104 : vector<16x64xf32>
    %107 = arith.mulf %101, %106 : vector<16x64xf32>
    %108 = arith.truncf %107 : vector<16x64xf32> to vector<16x64xbf16>
    %c0_49 = arith.constant 0 : index
    %c0_50 = arith.constant 0 : index
    %109 = vector.load %arg12[%c0_49, %c0_50] : memref<64x32xbf16, #tpu.memory_space<vmem>>, vector<64x32xbf16>
    %cst_51 = arith.constant dense<0.000000e+00> : vector<16x32xf32>
    %110 = tpu.matmul %108, %109, %cst_51 {dimension_numbers = #tpu.dot_dimension_numbers<[1], [0], [0], [1], [0, 0, 1, 1], [], []>} : vector<16x64xbf16>, vector<64x32xbf16>, vector<16x32xf32> -> vector<16x32xf32>
    %c0_52 = arith.constant 0 : index
    %c0_53 = arith.constant 0 : index
    %111 = vector.load %arg13[%c0_52, %c0_53] : memref<1x32xf32, #tpu.memory_space<vmem>>, vector<1x32xf32>
    %112 = vector.broadcast %111 : vector<1x32xf32> to vector<16x32xf32>
    %113 = arith.addf %110, %112 : vector<16x32xf32>
    %114 = arith.addf %69, %113 : vector<16x32xf32>
    %c0_54 = arith.constant 0 : index
    %c0_55 = arith.constant 0 : index
    %115 = vector.load %arg14[%c0_54, %c0_55] : memref<16x32xf32, #tpu.memory_space<vmem>>, vector<16x32xf32>
    tpu.vector_store %arg14[%c0_54, %c0_55], %114 {strides = array<i32>} : memref<16x32xf32, #tpu.memory_space<vmem>>, vector<16x32xf32>,
    return
  }
  func.func @transform_0(%arg0: i32) -> (i32, i32) {
    %c0_i32 = arith.constant 0 : i32
    %c0_i32_0 = arith.constant 0 : i32
    return %arg0, %c0_i32 : i32, i32
  }
  func.func @transform_1(%arg0: i32) -> (i32, i32) {
    %c0_i32 = arith.constant 0 : i32
    %c0_i32_0 = arith.constant 0 : i32
    %c0_i32_1 = arith.constant 0 : i32
    return %c0_i32, %c0_i32_0 : i32, i32
  }
  func.func @transform_2(%arg0: i32) -> (i32, i32) {
    %c0_i32 = arith.constant 0 : i32
    %c0_i32_0 = arith.constant 0 : i32
    %c0_i32_1 = arith.constant 0 : i32
    return %c0_i32, %c0_i32_0 : i32, i32
  }
  func.func @transform_3(%arg0: i32) -> (i32, i32) {
    %c0_i32 = arith.constant 0 : i32
    %c0_i32_0 = arith.constant 0 : i32
    %c0_i32_1 = arith.constant 0 : i32
    return %c0_i32, %c0_i32_0 : i32, i32
  }
  func.func @transform_4(%arg0: i32) -> (i32, i32) {
    %c0_i32 = arith.constant 0 : i32
    %c0_i32_0 = arith.constant 0 : i32
    %c0_i32_1 = arith.constant 0 : i32
    return %c0_i32, %c0_i32_0 : i32, i32
  }
  func.func @transform_5(%arg0: i32) -> (i32, i32) {
    %c0_i32 = arith.constant 0 : i32
    %c0_i32_0 = arith.constant 0 : i32
    %c0_i32_1 = arith.constant 0 : i32
    return %c0_i32, %c0_i32_0 : i32, i32
  }
  func.func @transform_6(%arg0: i32) -> (i32, i32) {
    %c0_i32 = arith.constant 0 : i32
    %c0_i32_0 = arith.constant 0 : i32
    %c0_i32_1 = arith.constant 0 : i32
    return %c0_i32, %c0_i32_0 : i32, i32
  }
  func.func @transform_7(%arg0: i32) -> (i32, i32) {
    %c0_i32 = arith.constant 0 : i32
    %c0_i32_0 = arith.constant 0 : i32
    %c0_i32_1 = arith.constant 0 : i32
    return %c0_i32, %c0_i32_0 : i32, i32
  }
  func.func @transform_8(%arg0: i32) -> (i32, i32) {
    %c0_i32 = arith.constant 0 : i32
    %c0_i32_0 = arith.constant 0 : i32
    %c0_i32_1 = arith.constant 0 : i32
    return %c0_i32, %c0_i32_0 : i32, i32
  }
  func.func @transform_9(%arg0: i32) -> (i32, i32) {
    %c0_i32 = arith.constant 0 : i32
    %c0_i32_0 = arith.constant 0 : i32
    %c0_i32_1 = arith.constant 0 : i32
    return %c0_i32, %c0_i32_0 : i32, i32
  }
  func.func @transform_10(%arg0: i32) -> (i32, i32) {
    %c0_i32 = arith.constant 0 : i32
    %c0_i32_0 = arith.constant 0 : i32
    %c0_i32_1 = arith.constant 0 : i32
    return %c0_i32, %c0_i32_0 : i32, i32
  }
  func.func @transform_11(%arg0: i32) -> (i32, i32) {
    %c0_i32 = arith.constant 0 : i32
    %c0_i32_0 = arith.constant 0 : i32
    %c0_i32_1 = arith.constant 0 : i32
    return %c0_i32, %c0_i32_0 : i32, i32
  }
  func.func @transform_12(%arg0: i32) -> (i32, i32) {
    %c0_i32 = arith.constant 0 : i32
    %c0_i32_0 = arith.constant 0 : i32
    %c0_i32_1 = arith.constant 0 : i32
    return %c0_i32, %c0_i32_0 : i32, i32
  }
  func.func @transform_13(%arg0: i32) -> (i32, i32) {
    %c0_i32 = arith.constant 0 : i32
    %c0_i32_0 = arith.constant 0 : i32
    return %arg0, %c0_i32 : i32, i32
  }
}

</mosaic_0001>

<bundles_post_ra>
// kernel: tpu_custom_call.1
= control target key start
LH: loop header
LB: loop body
LE: loop exit
PB: predicated region body
PF: predicated region fallthrough
CT: control target
= control target key end

     0   :  { %vm50_vm0 = vcmask 261120   ;;  %s892_s0 = inlined_call_operand.vmem [shape: f32[16,32], index: 0, kind: input, shape index: {}]   ;;  %s893_s1 = inlined_call_operand.vmem [shape: f32[1,32], index: 1, kind: input, shape index: {}]   ;;  %s894_s2 = inlined_call_operand.vmem [shape: f32[1,32], index: 2, kind: input, shape index: {}]   ;;  %s895_s3 = inlined_call_operand.vmem [shape: bf16[16,8], index: 3, kind: input, shape index: {}]   ;;  %s896_s4 = inlined_call_operand.vmem [shape: f32[16,1], index: 4, kind: input, shape index: {}]   ;;  %s897_s5 = inlined_call_operand.vmem [shape: bf16[8,16], index: 5, kind: input, shape index: {}]   ;;  %s898_s6 = inlined_call_operand.vmem [shape: f32[8,1], index: 6, kind: input, shape index: {}]   ;;  %s899_s7 = inlined_call_operand.vmem [shape: f32[1,32], index: 7, kind: input, shape index: {}]   ;;  %s900_s8 = inlined_call_operand.vmem [shape: f32[1,32], index: 8, kind: input, shape index: {}]   ;;  %s901_s9 = inlined_call_operand.vmem [shape: bf16[32,64], index: 9, kind: input, shape index: {}]   ;;  %s902_s10 = inlined_call_operand.vmem [shape: f32[1,64], index: 10, kind: input, shape index: {}]   ;;  %s903_s11 = inlined_call_operand.vmem [shape: bf16[64,32], index: 11, kind: input, shape index: {}]   ;;  %s904_s12 = inlined_call_operand.vmem [shape: f32[1,32], index: 12, kind: input, shape index: {}]   ;;  %s905_s13 = inlined_call_operand.hbm [shape: f32[16,32], index: 13, kind: output, shape index: {}]  }
   0x1   :  { %v771_v0 = vld [vmem:[%s892_s0] sm:$0xff]  ;;  %v776_v1 = vld [vmem:[%s892_s0 + $0x8] sm:$0xff] }
   0x2   :  { %v51_v2 = vsel %vm50_vm0, %v771_v0, 0.0  ;;  %v54_v3 = vsel %vm50_vm0, %v776_v1, 0.0 }
   0x3   :  { %52 = vadd.xlane.f32.xlu0 %v51_v2 }
   0x4   :  { %18 = vsyncpa [#allocation4], 0  ;;  %v692_v14 = vmov 0.0   ;;  %vm693_vm1 = vmmov 0   ;;  %v97_v15 = vld [vmem:[%s896_s4] sm:$0xff]  ;;  %v98_v16 = vld [vmem:[%s896_s4 + $0x8] sm:$0xff] }
   0x5   :  { %589 = vmatprep.subr.bf16.mxu0 %v692_v14  ;;  %595 = vmatprep.subr.bf16.mxu1 %v692_v14  ;;  %v694_v17 = vmov 0   ;;  %v99_v18 = vld [vmem:[%s898_s6] sm:$0xff]  ;;  %vm120_vm2 = vcmask 1043456   ;;  %vm116_vm3 = vcmask 64512   ;;  %vm181_vm4 = vcmask 130048   ;;  %s695_s16 = smov [#allocation3]  }
   0x6   :  { %591 = vmatprep.mubr.msk.bf16.mxu0 %vm693_vm1, %v692_v14  ;;  %597 = vmatprep.mubr.msk.bf16.mxu1 %vm693_vm1, %v692_v14  ;;  %v554_v26 = vld [vmem:[%s893_s1] ss:$0 sm:$0xff]  ;;  %vm489_vm5 = vcmask 523264   ;;  %s543_s4 = sshll.u32 %s695_s16, 4  ;;  %s544_s4 = int_to_ptr.vmem [resolvable:$true] %s543_s4 }
   0x7   :  { %55 = vadd.xlane.f32.xlu0 %v54_v3  ;;  %640 = vset.pattern.permute.xlu1 %v694_v17  ;;  %v555_v28 = vld [vmem:[%s894_s2] ss:$0 sm:$0xff]  ;;  %s668_s17 = scalar_lea.vmem %s544_s4, 256  ;;  %p673_p1 = scmp.lt.s32.totalorder %s544_s4, %s544_s4 }
   0x8   :  { %639 = vset.pattern.permute.xlu0 %v694_v17  ;;  %v641_v37 = vld [vmem:[%s895_s3] sm:$0xff]   ;;  %p669_p0 = scmp.ne.s32.totalorder %s544_s4, %s668_s17  ;;  %p674_p2 = scmp.lt.s32.totalorder %s668_s17, %s668_s17 }
   0xa   :  { %p675_p3 = por %p674_p2, %p673_p1 }
   0xc   :  { %p676_p4 = pnand %p675_p3, %p669_p0 }
  0x1d   :  { %103 = vperm.xlu0 %639, %v97_v15  }
  0x90   :  { %v53_v4 = vpop.xlane.xlu0 %52 }
  0x91   :  { %v58_v5 = vmul.f32 0.03125, %v53_v4 }
  0x93   :  { %v60_v6 = vsub.f32 %v771_v0, %v58_v5 }
  0x94   :  { %v56_v7 = vpop.xlane.xlu0 %55 }
  0x95   :  { %v59_v8 = vmul.f32 0.03125, %v56_v7  ;;  %v62_v9 = vmul.f32 %v60_v6, %v60_v6  ;;  %v96_v7 = vld [vmem:[%s897_s5] sm:$0xf] }
  0x97   :  { %v61_v10 = vsub.f32 %v776_v1, %v59_v8  ;;  %v64_v11 = vsel %vm50_vm0, %v62_v9, 0.0 }
  0x98   :  { %65 = vadd.xlane.f32.xlu1 %v64_v11 }
  0x99   :  { %v63_v12 = vmul.f32 %v61_v10, %v61_v10 }
  0x9b   :  { %v67_v13 = vsel %vm50_vm0, %v63_v12, 0.0 }
  0x9c   :  { %68 = vadd.xlane.f32.xlu1 %v67_v13  ;;  %v104_v40 = vpop.permute.xlu0 %103 }
  0xad   :  { %108 = vperm.xlu1 %640, %v98_v16  }
  0xb1   :  { %178 = vperm.xlu1 %640, %v99_v18  }
 0x125   :  { %v66_v19 = vpop.xlane.xlu1 %65 }
 0x126   :  { %v70_v20 = vmul.f32 0.03125, %v66_v19 }
 0x128   :  { %v72_v21 = vadd.f32 1e-05, %v70_v20 }
 0x129   :  { %v69_v22 = vpop.xlane.xlu1 %68 }
 0x12a   :  { %648 = vrsqrt.f32 %v72_v21  ;;  %v71_v23 = vmul.f32 0.03125, %v69_v22 }
 0x12c   :  { %v73_v24 = vadd.f32 1e-05, %v71_v23 }
 0x12d   :  { %v109_v45 = vpop.permute.xlu1 %108 }
 0x12e   :  { %650 = vrsqrt.f32 %v73_v24 }
 0x131   :  { %v179_v16 = vpop.permute.xlu1 %178 }
 0x134   :  { %v649_v25 = vpop.eup %648 }
 0x135   :  { %v76_v27 = vmul.f32 %v649_v25, %v60_v6 }
 0x137   :  { %v84_v29 = vmul.f32 %v554_v26, %v76_v27 }
 0x138   :  { %v651_v30 = vpop.eup %650 }
 0x139   :  { %v77_v31 = vmul.f32 %v651_v30, %v61_v10  ;;  %v92_v32 = vadd.f32 %v555_v28, %v84_v29 }
 0x13b   :  { %v85_v33 = vmul.f32 %v554_v26, %v77_v31  ;;  %v100_v34 = vpack.c.bf16 %v92_v32, %v92_v32 }
 0x13d   :  { %v93_v35 = vadd.f32 %v555_v28, %v85_v33  ;;  %v122_v36 = vsel %vm120_vm2, %v100_v34, 0 }
 0x13e   :  { %590 = vmatpush3.bf16.msra.mxu0 %v122_v36 }
 0x13f   :  { %v227_v38 = vpack.c.bf16 %v93_v35, %v93_v35  ;;  %601 = vmatprep.subr.bf16.mxu0 %v692_v14 }
 0x141   :  { %v229_v39 = vsel %vm120_vm2, %v227_v38, 0  ;;  %592 = vmatmul.mubr.msk.bf16.vlgmr.msra.gmra.mrb[0].mxu0 %vm116_vm3, %v641_v37 }
 0x142   :  { %602 = vmatpush3.bf16.msra.mxu0 %v229_v39  ;;  %603 = vmatprep.mubr.msk.bf16.mxu0 %vm693_vm1, %v692_v14 }
 0x143   :  { %613 = vmatprep.subr.bf16.mxu0 %v692_v14 }
 0x149   :  { %604 = vmatmul.mubr.msk.bf16.vlgmr.msra.gmra.mrb[4].mxu0 %vm116_vm3, %v641_v37 }
 0x14a   :  { %617 = vmatprep.mubr.msk.bf16.mxu0 %vm693_vm1, %v692_v14 }
 0x214   :  { %v158_v41 = vpop.f32.mrb[0].mxu0 }
 0x215   :  { %v159_v42 = vadd.f32 %v158_v41, %v104_v40  ;;  %v593_v43 = vpop.f32.mrb[1].mxu0  ;;  %v642_v41 = vld [vmem:[%s901_s9] sm:$0xff]  }
 0x216   :  { %v161_v44 = vpop.f32.mrb[2].mxu0  ;;  %614 = vmatpush3.bf16.msra.mxu0 %v642_v41 }
 0x217   :  { %v167_v46 = vmul.f32 0.70710677, %v159_v42  ;;  %v162_v47 = vadd.f32 %v161_v44, %v109_v45  ;;  %v594_v48 = vpop.f32.mrb[3].mxu0  ;;  %v165_v61 = vmul.f32 0.5, %v159_v42  ;;  %615 = vmatprep.subr.bf16.mxu0 %v692_v14  ;;  %v643_v42 = vld [vmem:[%s901_s9 + $0x8] sm:$0xff]  }
 0x219   :  { %652 = verf.f32 %v167_v46  ;;  %v168_v49 = vmul.f32 0.70710677, %v162_v47  ;;  %v166_v62 = vmul.f32 0.5, %v162_v47 }
 0x21a   :  { %616 = vmatpush3.bf16.msra.mxu0 %v643_v42 }
 0x21b   :  { %654 = verf.f32 %v168_v49 }
 0x21c   :  { %v265_v50 = vpop.f32.mrb[4].mxu0 }
 0x21d   :  { %v266_v51 = vadd.f32 %v265_v50, %v104_v40  ;;  %v605_v52 = vpop.f32.mrb[5].mxu0 }
 0x21e   :  { %v268_v53 = vpop.f32.mrb[6].mxu0 }
 0x21f   :  { %v274_v54 = vmul.f32 0.70710677, %v266_v51  ;;  %v269_v55 = vadd.f32 %v268_v53, %v109_v45  ;;  %v606_v56 = vpop.f32.mrb[7].mxu0  ;;  %v272_v9 = vmul.f32 0.5, %v266_v51  ;;  %v561_v51 = vld [vmem:[%s899_s7] ss:$0 sm:$0xff] }
 0x221   :  { %656 = verf.f32 %v274_v54  ;;  %v275_v57 = vmul.f32 0.70710677, %v269_v55  ;;  %v273_v10 = vmul.f32 0.5, %v269_v55  ;;  %v562_v55 = vld [vmem:[%s900_s8] ss:$0 sm:$0xff] }
 0x223   :  { %v653_v58 = vpop.eup %652  ;;  %658 = verf.f32 %v275_v57 }
 0x224   :  { %v171_v59 = vadd.f32 1.0, %v653_v58 }
 0x225   :  { %v655_v60 = vpop.eup %654 }
 0x226   :  { %v172_v63 = vadd.f32 1.0, %v655_v60  ;;  %v173_v2 = vmul.f32 %v171_v59, %v165_v61  ;;  %v644_v60 = vld [vmem:[%s903_s11] sm:$0xff]   ;;  %v645_v61 = vld [vmem:[%s903_s11 + $0x8] sm:$0xff]  }
 0x228   :  { %v174_v3 = vmul.f32 %v172_v63, %v166_v62  ;;  %v646_v62 = vld [vmem:[%s903_s11 + $0x10] sm:$0xff]   ;;  %v647_v63 = vld [vmem:[%s903_s11 + $0x18] sm:$0xff]  }
 0x22a   :  { %v175_v4 = vpack.c.bf16 %v174_v3, %v173_v2  ;;  %v563_v2 = vld [vmem:[%s902_s10] ss:$0 sm:$0xff] }
 0x22b   :  { %v657_v5 = vpop.eup %656 }
 0x22c   :  { %v278_v6 = vadd.f32 1.0, %v657_v5  ;;  %596 = vmatpush3.bf16.msra.mxu1 %v175_v4 }
 0x22d   :  { %v659_v8 = vpop.eup %658  ;;  %607 = vmatprep.subr.bf16.mxu1 %v692_v14 }
 0x22e   :  { %v279_v11 = vadd.f32 1.0, %v659_v8  ;;  %v280_v12 = vmul.f32 %v278_v6, %v272_v9 }
 0x22f   :  { %598 = vmatmul.mubr.msk.bf16.vlgmr.msra.gmra.mrb[0].mxu1 %vm181_vm4, %v96_v7 }
 0x230   :  { %v281_v13 = vmul.f32 %v279_v11, %v273_v10  ;;  %609 = vmatprep.mubr.msk.bf16.mxu1 %vm693_vm1, %v692_v14 }
 0x232   :  { %v282_v15 = vpack.c.bf16 %v281_v13, %v280_v12 }
 0x234   :  { %608 = vmatpush3.bf16.msra.mxu1 %v282_v15 }
 0x235   :  { %621 = vmatprep.subr.bf16.mxu1 %v692_v14 }
 0x237   :  { %610 = vmatmul.mubr.msk.bf16.vlgmr.msra.gmra.mrb[4].mxu1 %vm181_vm4, %v96_v7 }
 0x238   :  { %629 = vmatprep.mubr.msk.bf16.mxu1 %vm693_vm1, %v692_v14  ;;  %622 = vmatpush3.bf16.msra.mxu1 %v644_v60 }
 0x239   :  { %623 = vmatprep.subr.bf16.mxu1 %v692_v14 }
 0x23c   :  { %624 = vmatpush3.bf16.msra.mxu1 %v645_v61 }
 0x23d   :  { %625 = vmatprep.subr.bf16.mxu1 %v692_v14 }
 0x240   :  { %626 = vmatpush3.bf16.msra.mxu1 %v646_v62 }
 0x241   :  { %627 = vmatprep.subr.bf16.mxu1 %v692_v14 }
 0x244   :  { %628 = vmatpush3.bf16.msra.mxu1 %v647_v63 }
 0x302   :  { %v219_v17 = vpop.f32.mrb[0].mxu1 }
 0x303   :  { %v220_v18 = vadd.f32 %v219_v17, %v179_v16  ;;  %v599_v19 = vpop.f32.mrb[1].mxu1 }
 0x304   :  { %v222_v20 = vpop.f32.mrb[2].mxu1 }
 0x305   :  { %v225_v21 = vadd.f32 %v220_v18, %v771_v0  ;;  %v600_v22 = vpop.f32.mrb[3].mxu1  ;;  %v567_v20 = vld [vmem:[%s904_s12] ss:$0 sm:$0xff] }
 0x307   :  { %226 = vst.msk [vmem:[#allocation2] sm:$0xff] %vm50_vm0, %v225_v21 }
 0x30a   :  { %v317_v23 = vpop.f32.mrb[4].mxu1 }
 0x30b   :  { %v318_v24 = vadd.f32 %v317_v23, %v179_v16  ;;  %v611_v25 = vpop.f32.mrb[5].mxu1 }
 0x30c   :  { %v320_v26 = vpop.f32.mrb[6].mxu1 }
 0x30d   :  { %v323_v27 = vadd.f32 %v318_v24, %v776_v1  ;;  %v612_v28 = vpop.f32.mrb[7].mxu1 }
 0x30e   :  { %v828_v29 = vld [vmem:[#allocation2] sm:$0xff] }
 0x30f   :  { %324 = vst.msk [vmem:[#allocation2 + $0x8] sm:$0xff] %vm50_vm0, %v323_v27  ;;  %v329_v30 = vsel %vm50_vm0, %v828_v29, 0.0 }
 0x310   :  { %330 = vadd.xlane.f32.xlu1 %v329_v30 }
 0x316   :  { %v833_v31 = vld [vmem:[#allocation2 + $0x8] sm:$0xff] }
 0x317   :  { %v332_v0 = vsel %vm50_vm0, %v833_v31, 0.0 }
 0x318   :  { %333 = vadd.xlane.f32.xlu0 %v332_v0 }
 0x39d   :  { %v331_v32 = vpop.xlane.xlu1 %330 }
 0x39e   :  { %v335_v33 = vmul.f32 0.03125, %v331_v32 }
 0x3a0   :  { %v337_v34 = vsub.f32 %v828_v29, %v335_v33 }
 0x3a2   :  { %v339_v1 = vmul.f32 %v337_v34, %v337_v34 }
 0x3a4   :  { %v341_v35 = vsel %vm50_vm0, %v339_v1, 0.0 }
 0x3a5   :  { %342 = vadd.xlane.f32.xlu1 %v341_v35  ;;  %v334_v36 = vpop.xlane.xlu0 %333 }
 0x3a6   :  { %v336_v37 = vmul.f32 0.03125, %v334_v36 }
 0x3a8   :  { %v338_v38 = vsub.f32 %v833_v31, %v336_v37 }
 0x3aa   :  { %v340_v39 = vmul.f32 %v338_v38, %v338_v38 }
 0x3ac   :  { %v344_v40 = vsel %vm50_vm0, %v340_v39, 0.0 }
 0x3ad   :  { %345 = vadd.xlane.f32.xlu1 %v344_v40 }
 0x432   :  { %v343_v43 = vpop.xlane.xlu1 %342 }
 0x433   :  { %v347_v44 = vmul.f32 0.03125, %v343_v43 }
 0x435   :  { %v349_v45 = vadd.f32 1e-05, %v347_v44 }
 0x437   :  { %660 = vrsqrt.f32 %v349_v45 }
 0x43a   :  { %v346_v46 = vpop.xlane.xlu1 %345 }
 0x43b   :  { %v348_v47 = vmul.f32 0.03125, %v346_v46 }
 0x43d   :  { %v350_v48 = vadd.f32 1e-05, %v348_v47 }
 0x43f   :  { %662 = vrsqrt.f32 %v350_v48 }
 0x441   :  { %v661_v49 = vpop.eup %660 }
 0x442   :  { %v353_v50 = vmul.f32 %v661_v49, %v337_v34 }
 0x444   :  { %v361_v53 = vmul.f32 %v561_v51, %v353_v50 }
 0x446   :  { %v369_v57 = vadd.f32 %v562_v55, %v361_v53 }
 0x449   :  { %v663_v52 = vpop.eup %662 }
 0x44a   :  { %v354_v54 = vmul.f32 %v663_v52, %v338_v38 }
 0x44c   :  { %v362_v56 = vmul.f32 %v561_v51, %v354_v54 }
 0x44e   :  { %v370_v58 = vadd.f32 %v562_v55, %v362_v56 }
 0x450   :  { %v371_v59 = vpack.c.bf16 %v370_v58, %v369_v57 }
 0x452   :  { %618 = vmatmul.mubr.msk.bf16.vlgmr.msra.gmra.mrb[8].mxu0 %vm50_vm0, %v371_v59 }
 0x525   :  { %v432_v3 = vpop.f32.mrb[8].mxu0 }
 0x526   :  { %v433_v4 = vadd.f32 %v563_v2, %v432_v3  ;;  %v619_v5 = vpop.f32.mrb[9].mxu0 }
 0x527   :  { %v435_v6 = vpop.f32.mrb[10].mxu0 }
 0x528   :  { %v441_v7 = vmul.f32 0.70710677, %v433_v4  ;;  %v436_v8 = vadd.f32 %v563_v2, %v435_v6  ;;  %v620_v9 = vpop.f32.mrb[11].mxu0  ;;  %v439_v13 = vmul.f32 0.5, %v433_v4 }
 0x52a   :  { %664 = verf.f32 %v441_v7  ;;  %v442_v10 = vmul.f32 0.70710677, %v436_v8  ;;  %v440_v15 = vmul.f32 0.5, %v436_v8 }
 0x52c   :  { %666 = verf.f32 %v442_v10 }
 0x534   :  { %v665_v14 = vpop.eup %664 }
 0x535   :  { %v445_v11 = vadd.f32 1.0, %v665_v14 }
 0x536   :  { %v667_v12 = vpop.eup %666 }
 0x537   :  { %v446_v16 = vadd.f32 1.0, %v667_v12  ;;  %v447_v17 = vmul.f32 %v445_v11, %v439_v13 }
 0x539   :  { %v448_v18 = vmul.f32 %v446_v16, %v440_v15 }
 0x53b   :  { %v449_v19 = vpack.c.bf16 %v448_v18, %v447_v17 }
 0x53d   :  { %630 = vmatmul.mubr.msk.bf16.vlgmr.msra.gmra.mrb[8].mxu1 %vm489_vm5, %v449_v19 }
 0x610   :  { %v527_v21 = vpop.f32.mrb[8].mxu1 }
 0x611   :  { %v528_v22 = vadd.f32 %v567_v20, %v527_v21  ;;  %v631_v23 = vpop.f32.mrb[9].mxu1 }
 0x612   :  { %v530_v24 = vpop.f32.mrb[10].mxu1 }
 0x613   :  { %v534_v25 = vadd.f32 %v528_v22, %v828_v29  ;;  %v531_v26 = vadd.f32 %v567_v20, %v530_v24  ;;  %v632_v27 = vpop.f32.mrb[11].mxu1 }
 0x615   :  { %536 = vst.msk [vmem:[#allocation3] sm:$0xff] %vm50_vm0, %v534_v25  ;;  %v535_v28 = vadd.f32 %v531_v26, %v833_v31 }
 0x617   :  { %537 = vst.msk [vmem:[#allocation3 + $0x8] sm:$0xff] %vm50_vm0, %v535_v28 }
 0x618   :  { %679 = shalt.err (!%p676_p4)
}
 0x619   :  { %s680_s19 = scalar_lea.hbm %s905_s13, 256 }
 0x61a   :  { %p681_p5 = scmp.ne.s32.totalorder %s905_s13, %s680_s19  ;;  %p684_p6 = scmp.lt.u32.totalorder %s680_s19, %s905_s13 }
 0x61c   :  { %p686_p7 = pnand %p684_p6, %p681_p5 }
 0x61e   :  { %689 = shalt.err (!%p686_p7)
}
 0x61f   :  { %s696_s3 = smov 128   ;;  %s697_s5 = smov 8  }
 0x620   :  { %549 = dma.vmem_to_hbm [thread:$0]  %s544_s4, 256, %s905_s13, [#allocation4], %s696_s3, %s696_s3, %s697_s5  }
 0x621   :  { %690 = dma.done.wait [#allocation4], 256  }
 0x622   :  { %691 = vsyncadd [#allocation4], 4294967040 }
 0x623   :  { %553 = vsyncpa [#allocation4], 1 }

// kernel: tpu_custom_call.1
= control target key start
LH: loop header
LB: loop body
LE: loop exit
PB: predicated region body
PF: predicated region fallthrough
CT: control target
= control target key end

     0   :  { %vm50_vm0 = vcmask 261120   ;;  %s892_s0 = inlined_call_operand.vmem [shape: f32[16,32], index: 0, kind: input, shape index: {}]   ;;  %s893_s1 = inlined_call_operand.vmem [shape: f32[1,32], index: 1, kind: input, shape index: {}]   ;;  %s894_s2 = inlined_call_operand.vmem [shape: f32[1,32], index: 2, kind: input, shape index: {}]   ;;  %s895_s3 = inlined_call_operand.vmem [shape: bf16[16,8], index: 3, kind: input, shape index: {}]   ;;  %s896_s4 = inlined_call_operand.vmem [shape: f32[16,1], index: 4, kind: input, shape index: {}]   ;;  %s897_s5 = inlined_call_operand.vmem [shape: bf16[8,16], index: 5, kind: input, shape index: {}]   ;;  %s898_s6 = inlined_call_operand.vmem [shape: f32[8,1], index: 6, kind: input, shape index: {}]   ;;  %s899_s7 = inlined_call_operand.vmem [shape: f32[1,32], index: 7, kind: input, shape index: {}]   ;;  %s900_s8 = inlined_call_operand.vmem [shape: f32[1,32], index: 8, kind: input, shape index: {}]   ;;  %s901_s9 = inlined_call_operand.vmem [shape: bf16[32,64], index: 9, kind: input, shape index: {}]   ;;  %s902_s10 = inlined_call_operand.vmem [shape: f32[1,64], index: 10, kind: input, shape index: {}]   ;;  %s903_s11 = inlined_call_operand.vmem [shape: bf16[64,32], index: 11, kind: input, shape index: {}]   ;;  %s904_s12 = inlined_call_operand.vmem [shape: f32[1,32], index: 12, kind: input, shape index: {}]   ;;  %s905_s13 = inlined_call_operand.hbm [shape: f32[16,32], index: 13, kind: output, shape index: {}]  }
   0x1   :  { %v771_v0 = vld [vmem:[%s892_s0] sm:$0xff]  ;;  %v776_v1 = vld [vmem:[%s892_s0 + $0x8] sm:$0xff] }
   0x2   :  { %v51_v2 = vsel %vm50_vm0, %v771_v0, 0.0  ;;  %v54_v3 = vsel %vm50_vm0, %v776_v1, 0.0 }
   0x3   :  { %52 = vadd.xlane.f32.xlu0 %v51_v2 }
   0x4   :  { %18 = vsyncpa [#allocation4], 0  ;;  %v692_v14 = vmov 0.0   ;;  %vm693_vm1 = vmmov 0   ;;  %v97_v15 = vld [vmem:[%s896_s4] sm:$0xff]  ;;  %v98_v16 = vld [vmem:[%s896_s4 + $0x8] sm:$0xff] }
   0x5   :  { %589 = vmatprep.subr.bf16.mxu0 %v692_v14  ;;  %595 = vmatprep.subr.bf16.mxu1 %v692_v14  ;;  %v694_v17 = vmov 0   ;;  %v99_v18 = vld [vmem:[%s898_s6] sm:$0xff]  ;;  %vm120_vm2 = vcmask 1043456   ;;  %vm116_vm3 = vcmask 64512   ;;  %vm181_vm4 = vcmask 130048   ;;  %s695_s16 = smov [#allocation3]  }
   0x6   :  { %591 = vmatprep.mubr.msk.bf16.mxu0 %vm693_vm1, %v692_v14  ;;  %597 = vmatprep.mubr.msk.bf16.mxu1 %vm693_vm1, %v692_v14  ;;  %v554_v26 = vld [vmem:[%s893_s1] ss:$0 sm:$0xff]  ;;  %vm489_vm5 = vcmask 523264   ;;  %s543_s4 = sshll.u32 %s695_s16, 4  ;;  %s544_s4 = int_to_ptr.vmem [resolvable:$true] %s543_s4 }
   0x7   :  { %55 = vadd.xlane.f32.xlu0 %v54_v3  ;;  %640 = vset.pattern.permute.xlu1 %v694_v17  ;;  %v555_v28 = vld [vmem:[%s894_s2] ss:$0 sm:$0xff]  ;;  %s668_s17 = scalar_lea.vmem %s544_s4, 256  ;;  %p673_p1 = scmp.lt.s32.totalorder %s544_s4, %s544_s4 }
   0x8   :  { %639 = vset.pattern.permute.xlu0 %v694_v17  ;;  %v641_v37 = vld [vmem:[%s895_s3] sm:$0xff]   ;;  %p669_p0 = scmp.ne.s32.totalorder %s544_s4, %s668_s17  ;;  %p674_p2 = scmp.lt.s32.totalorder %s668_s17, %s668_s17 }
   0xa   :  { %p675_p3 = por %p674_p2, %p673_p1 }
   0xc   :  { %p676_p4 = pnand %p675_p3, %p669_p0 }
  0x1d   :  { %103 = vperm.xlu0 %639, %v97_v15  }
  0x90   :  { %v53_v4 = vpop.xlane.xlu0 %52 }
  0x91   :  { %v58_v5 = vmul.f32 0.03125, %v53_v4 }
  0x93   :  { %v60_v6 = vsub.f32 %v771_v0, %v58_v5 }
  0x94   :  { %v56_v7 = vpop.xlane.xlu0 %55 }
  0x95   :  { %v59_v8 = vmul.f32 0.03125, %v56_v7  ;;  %v62_v9 = vmul.f32 %v60_v6, %v60_v6  ;;  %v96_v7 = vld [vmem:[%s897_s5] sm:$0xf] }
  0x97   :  { %v61_v10 = vsub.f32 %v776_v1, %v59_v8  ;;  %v64_v11 = vsel %vm50_vm0, %v62_v9, 0.0 }
  0x98   :  { %65 = vadd.xlane.f32.xlu1 %v64_v11 }
  0x99   :  { %v63_v12 = vmul.f32 %v61_v10, %v61_v10 }
  0x9b   :  { %v67_v13 = vsel %vm50_vm0, %v63_v12, 0.0 }
  0x9c   :  { %68 = vadd.xlane.f32.xlu1 %v67_v13  ;;  %v104_v40 = vpop.permute.xlu0 %103 }
  0xad   :  { %108 = vperm.xlu1 %640, %v98_v16  }
  0xb1   :  { %178 = vperm.xlu1 %640, %v99_v18  }
 0x125   :  { %v66_v19 = vpop.xlane.xlu1 %65 }
 0x126   :  { %v70_v20 = vmul.f32 0.03125, %v66_v19 }
 0x128   :  { %v72_v21 = vadd.f32 1e-05, %v70_v20 }
 0x129   :  { %v69_v22 = vpop.xlane.xlu1 %68 }
 0x12a   :  { %648 = vrsqrt.f32 %v72_v21  ;;  %v71_v23 = vmul.f32 0.03125, %v69_v22 }
 0x12c   :  { %v73_v24 = vadd.f32 1e-05, %v71_v23 }
 0x12d   :  { %v109_v45 = vpop.permute.xlu1 %108 }
 0x12e   :  { %650 = vrsqrt.f32 %v73_v24 }
 0x131   :  { %v179_v16 = vpop.permute.xlu1 %178 }
 0x134   :  { %v649_v25 = vpop.eup %648 }
 0x135   :  { %v76_v27 = vmul.f32 %v649_v25, %v60_v6 }
 0x137   :  { %v84_v29 = vmul.f32 %v554_v26, %v76_v27 }
 0x138   :  { %v651_v30 = vpop.eup %650 }
 0x139   :  { %v77_v31 = vmul.f32 %v651_v30, %v61_v10  ;;  %v92_v32 = vadd.f32 %v555_v28, %v84_v29 }
 0x13b   :  { %v85_v33 = vmul.f32 %v554_v26, %v77_v31  ;;  %v100_v34 = vpack.c.bf16 %v92_v32, %v92_v32 }
 0x13d   :  { %v93_v35 = vadd.f32 %v555_v28, %v85_v33  ;;  %v122_v36 = vsel %vm120_vm2, %v100_v34, 0 }
 0x13e   :  { %590 = vmatpush3.bf16.msra.mxu0 %v122_v36 }
 0x13f   :  { %v227_v38 = vpack.c.bf16 %v93_v35, %v93_v35  ;;  %601 = vmatprep.subr.bf16.mxu0 %v692_v14 }
 0x141   :  { %v229_v39 = vsel %vm120_vm2, %v227_v38, 0  ;;  %592 = vmatmul.mubr.msk.bf16.vlgmr.msra.gmra.mrb[0].mxu0 %vm116_vm3, %v641_v37 }
 0x142   :  { %602 = vmatpush3.bf16.msra.mxu0 %v229_v39  ;;  %603 = vmatprep.mubr.msk.bf16.mxu0 %vm693_vm1, %v692_v14 }
 0x143   :  { %613 = vmatprep.subr.bf16.mxu0 %v692_v14 }
 0x149   :  { %604 = vmatmul.mubr.msk.bf16.vlgmr.msra.gmra.mrb[4].mxu0 %vm116_vm3, %v641_v37 }
 0x14a   :  { %617 = vmatprep.mubr.msk.bf16.mxu0 %vm693_vm1, %v692_v14 }
 0x214   :  { %v158_v41 = vpop.f32.mrb[0].mxu0 }
 0x215   :  { %v159_v42 = vadd.f32 %v158_v41, %v104_v40  ;;  %v593_v43 = vpop.f32.mrb[1].mxu0  ;;  %v642_v41 = vld [vmem:[%s901_s9] sm:$0xff]  }
 0x216   :  { %v161_v44 = vpop.f32.mrb[2].mxu0  ;;  %614 = vmatpush3.bf16.msra.mxu0 %v642_v41 }
 0x217   :  { %v167_v46 = vmul.f32 0.70710677, %v159_v42  ;;  %v162_v47 = vadd.f32 %v161_v44, %v109_v45  ;;  %v594_v48 = vpop.f32.mrb[3].mxu0  ;;  %v165_v61 = vmul.f32 0.5, %v159_v42  ;;  %615 = vmatprep.subr.bf16.mxu0 %v692_v14  ;;  %v643_v42 = vld [vmem:[%s901_s9 + $0x8] sm:$0xff]  }
 0x219   :  { %652 = verf.f32 %v167_v46  ;;  %v168_v49 = vmul.f32 0.70710677, %v162_v47  ;;  %v166_v62 = vmul.f32 0.5, %v162_v47 }
 0x21a   :  { %616 = vmatpush3.bf16.msra.mxu0 %v643_v42 }
 0x21b   :  { %654 = verf.f32 %v168_v49 }
 0x21c   :  { %v265_v50 = vpop.f32.mrb[4].mxu0 }
 0x21d   :  { %v266_v51 = vadd.f32 %v265_v50, %v104_v40  ;;  %v605_v52 = vpop.f32.mrb[5].mxu0 }
 0x21e   :  { %v268_v53 = vpop.f32.mrb[6].mxu0 }
 0x21f   :  { %v274_v54 = vmul.f32 0.70710677, %v266_v51  ;;  %v269_v55 = vadd.f32 %v268_v53, %v109_v45  ;;  %v606_v56 = vpop.f32.mrb[7].mxu0  ;;  %v272_v9 = vmul.f32 0.5, %v266_v51  ;;  %v561_v51 = vld [vmem:[%s899_s7] ss:$0 sm:$0xff] }
 0x221   :  { %656 = verf.f32 %v274_v54  ;;  %v275_v57 = vmul.f32 0.70710677, %v269_v55  ;;  %v273_v10 = vmul.f32 0.5, %v269_v55  ;;  %v562_v55 = vld [vmem:[%s900_s8] ss:$0 sm:$0xff] }
 0x223   :  { %v653_v58 = vpop.eup %652  ;;  %658 = verf.f32 %v275_v57 }
 0x224   :  { %v171_v59 = vadd.f32 1.0, %v653_v58 }
 0x225   :  { %v655_v60 = vpop.eup %654 }
 0x226   :  { %v172_v63 = vadd.f32 1.0, %v655_v60  ;;  %v173_v2 = vmul.f32 %v171_v59, %v165_v61  ;;  %v644_v60 = vld [vmem:[%s903_s11] sm:$0xff]   ;;  %v645_v61 = vld [vmem:[%s903_s11 + $0x8] sm:$0xff]  }
 0x228   :  { %v174_v3 = vmul.f32 %v172_v63, %v166_v62  ;;  %v646_v62 = vld [vmem:[%s903_s11 + $0x10] sm:$0xff]   ;;  %v647_v63 = vld [vmem:[%s903_s11 + $0x18] sm:$0xff]  }
 0x22a   :  { %v175_v4 = vpack.c.bf16 %v174_v3, %v173_v2  ;;  %v563_v2 = vld [vmem:[%s902_s10] ss:$0 sm:$0xff] }
 0x22b   :  { %v657_v5 = vpop.eup %656 }
 0x22c   :  { %v278_v6 = vadd.f32 1.0, %v657_v5  ;;  %596 = vmatpush3.bf16.msra.mxu1 %v175_v4 }
 0x22d   :  { %v659_v8 = vpop.eup %658  ;;  %607 = vmatprep.subr.bf16.mxu1 %v692_v14 }
 0x22e   :  { %v279_v11 = vadd.f32 1.0, %v659_v8  ;;  %v280_v12 = vmul.f32 %v278_v6, %v272_v9 }
 0x22f   :  { %598 = vmatmul.mubr.msk.bf16.vlgmr.msra.gmra.mrb[0].mxu1 %vm181_vm4, %v96_v7 }
 0x230   :  { %v281_v13 = vmul.f32 %v279_v11, %v273_v10  ;;  %609 = vmatprep.mubr.msk.bf16.mxu1 %vm693_vm1, %v692_v14 }
 0x232   :  { %v282_v15 = vpack.c.bf16 %v281_v13, %v280_v12 }
 0x234   :  { %608 = vmatpush3.bf16.msra.mxu1 %v282_v15 }
 0x235   :  { %621 = vmatprep.subr.bf16.mxu1 %v692_v14 }
 0x237   :  { %610 = vmatmul.mubr.msk.bf16.vlgmr.msra.gmra.mrb[4].mxu1 %vm181_vm4, %v96_v7 }
 0x238   :  { %629 = vmatprep.mubr.msk.bf16.mxu1 %vm693_vm1, %v692_v14  ;;  %622 = vmatpush3.bf16.msra.mxu1 %v644_v60 }
 0x239   :  { %623 = vmatprep.subr.bf16.mxu1 %v692_v14 }
 0x23c   :  { %624 = vmatpush3.bf16.msra.mxu1 %v645_v61 }
 0x23d   :  { %625 = vmatprep.subr.bf16.mxu1 %v692_v14 }
 0x240   :  { %626 = vmatpush3.bf16.msra.mxu1 %v646_v62 }
 0x241   :  { %627 = vmatprep.subr.bf16.mxu1 %v692_v14 }
 0x244   :  { %628 = vmatpush3.bf16.msra.mxu1 %v647_v63 }
 0x302   :  { %v219_v17 = vpop.f32.mrb[0].mxu1 }
 0x303   :  { %v220_v18 = vadd.f32 %v219_v17, %v179_v16  ;;  %v599_v19 = vpop.f32.mrb[1].mxu1 }
 0x304   :  { %v222_v20 = vpop.f32.mrb[2].mxu1 }
 0x305   :  { %v225_v21 = vadd.f32 %v220_v18, %v771_v0  ;;  %v600_v22 = vpop.f32.mrb[3].mxu1  ;;  %v567_v20 = vld [vmem:[%s904_s12] ss:$0 sm:$0xff] }
 0x307   :  { %226 = vst.msk [vmem:[#allocation2] sm:$0xff] %vm50_vm0, %v225_v21 }
 0x30a   :  { %v317_v23 = vpop.f32.mrb[4].mxu1 }
 0x30b   :  { %v318_v24 = vadd.f32 %v317_v23, %v179_v16  ;;  %v611_v25 = vpop.f32.mrb[5].mxu1 }
 0x30c   :  { %v320_v26 = vpop.f32.mrb[6].mxu1 }
 0x30d   :  { %v323_v27 = vadd.f32 %v318_v24, %v776_v1  ;;  %v612_v28 = vpop.f32.mrb[7].mxu1 }
 0x30e   :  { %v828_v29 = vld [vmem:[#allocation2] sm:$0xff] }
 0x30f   :  { %324 = vst.msk [vmem:[#allocation2 + $0x8] sm:$0xff] %vm50_vm0, %v323_v27  ;;  %v329_v30 = vsel %vm50_vm0, %v828_v29, 0.0 }
 0x310   :  { %330 = vadd.xlane.f32.xlu1 %v329_v30 }
 0x316   :  { %v833_v31 = vld [vmem:[#allocation2 + $0x8] sm:$0xff] }
 0x317   :  { %v332_v0 = vsel %vm50_vm0, %v833_v31, 0.0 }
 0x318   :  { %333 = vadd.xlane.f32.xlu0 %v332_v0 }
 0x39d   :  { %v331_v32 = vpop.xlane.xlu1 %330 }
 0x39e   :  { %v335_v33 = vmul.f32 0.03125, %v331_v32 }
 0x3a0   :  { %v337_v34 = vsub.f32 %v828_v29, %v335_v33 }
 0x3a2   :  { %v339_v1 = vmul.f32 %v337_v34, %v337_v34 }
 0x3a4   :  { %v341_v35 = vsel %vm50_vm0, %v339_v1, 0.0 }
 0x3a5   :  { %342 = vadd.xlane.f32.xlu1 %v341_v35  ;;  %v334_v36 = vpop.xlane.xlu0 %333 }
 0x3a6   :  { %v336_v37 = vmul.f32 0.03125, %v334_v36 }
 0x3a8   :  { %v338_v38 = vsub.f32 %v833_v31, %v336_v37 }
 0x3aa   :  { %v340_v39 = vmul.f32 %v338_v38, %v338_v38 }
 0x3ac   :  { %v344_v40 = vsel %vm50_vm0, %v340_v39, 0.0 }
 0x3ad   :  { %345 = vadd.xlane.f32.xlu1 %v344_v40 }
 0x432   :  { %v343_v43 = vpop.xlane.xlu1 %342 }
 0x433   :  { %v347_v44 = vmul.f32 0.03125, %v343_v43 }
 0x435   :  { %v349_v45 = vadd.f32 1e-05, %v347_v44 }
 0x437   :  { %660 = vrsqrt.f32 %v349_v45 }
 0x43a   :  { %v346_v46 = vpop.xlane.xlu1 %345 }
 0x43b   :  { %v348_v47 = vmul.f32 0.03125, %v346_v46 }
 0x43d   :  { %v350_v48 = vadd.f32 1e-05, %v348_v47 }
 0x43f   :  { %662 = vrsqrt.f32 %v350_v48 }
 0x441   :  { %v661_v49 = vpop.eup %660 }
 0x442   :  { %v353_v50 = vmul.f32 %v661_v49, %v337_v34 }
 0x444   :  { %v361_v53 = vmul.f32 %v561_v51, %v353_v50 }
 0x446   :  { %v369_v57 = vadd.f32 %v562_v55, %v361_v53 }
 0x449   :  { %v663_v52 = vpop.eup %662 }
 0x44a   :  { %v354_v54 = vmul.f32 %v663_v52, %v338_v38 }
 0x44c   :  { %v362_v56 = vmul.f32 %v561_v51, %v354_v54 }
 0x44e   :  { %v370_v58 = vadd.f32 %v562_v55, %v362_v56 }
 0x450   :  { %v371_v59 = vpack.c.bf16 %v370_v58, %v369_v57 }
 0x452   :  { %618 = vmatmul.mubr.msk.bf16.vlgmr.msra.gmra.mrb[8].mxu0 %vm50_vm0, %v371_v59 }
 0x525   :  { %v432_v3 = vpop.f32.mrb[8].mxu0 }
 0x526   :  { %v433_v4 = vadd.f32 %v563_v2, %v432_v3  ;;  %v619_v5 = vpop.f32.mrb[9].mxu0 }
 0x527   :  { %v435_v6 = vpop.f32.mrb[10].mxu0 }
 0x528   :  { %v441_v7 = vmul.f32 0.70710677, %v433_v4  ;;  %v436_v8 = vadd.f32 %v563_v2, %v435_v6  ;;  %v620_v9 = vpop.f32.mrb[11].mxu0  ;;  %v439_v13 = vmul.f32 0.5, %v433_v4 }
 0x52a   :  { %664 = verf.f32 %v441_v7  ;;  %v442_v10 = vmul.f32 0.70710677, %v436_v8  ;;  %v440_v15 = vmul.f32 0.5, %v436_v8 }
 0x52c   :  { %666 = verf.f32 %v442_v10 }
 0x534   :  { %v665_v14 = vpop.eup %664 }
 0x535   :  { %v445_v11 = vadd.f32 1.0, %v665_v14 }
 0x536   :  { %v667_v12 = vpop.eup %666 }
 0x537   :  { %v446_v16 = vadd.f32 1.0, %v667_v12  ;;  %v447_v17 = vmul.f32 %v445_v11, %v439_v13 }
 0x539   :  { %v448_v18 = vmul.f32 %v446_v16, %v440_v15 }
 0x53b   :  { %v449_v19 = vpack.c.bf16 %v448_v18, %v447_v17 }
 0x53d   :  { %630 = vmatmul.mubr.msk.bf16.vlgmr.msra.gmra.mrb[8].mxu1 %vm489_vm5, %v449_v19 }
 0x610   :  { %v527_v21 = vpop.f32.mrb[8].mxu1 }
 0x611   :  { %v528_v22 = vadd.f32 %v567_v20, %v527_v21  ;;  %v631_v23 = vpop.f32.mrb[9].mxu1 }
 0x612   :  { %v530_v24 = vpop.f32.mrb[10].mxu1 }
 0x613   :  { %v534_v25 = vadd.f32 %v528_v22, %v828_v29  ;;  %v531_v26 = vadd.f32 %v567_v20, %v530_v24  ;;  %v632_v27 = vpop.f32.mrb[11].mxu1 }
 0x615   :  { %536 = vst.msk [vmem:[#allocation3] sm:$0xff] %vm50_vm0, %v534_v25  ;;  %v535_v28 = vadd.f32 %v531_v26, %v833_v31 }
 0x617   :  { %537 = vst.msk [vmem:[#allocation3 + $0x8] sm:$0xff] %vm50_vm0, %v535_v28 }
 0x618   :  { %679 = shalt.err (!%p676_p4)
}
 0x619   :  { %s680_s19 = scalar_lea.hbm %s905_s13, 256 }
 0x61a   :  { %p681_p5 = scmp.ne.s32.totalorder %s905_s13, %s680_s19  ;;  %p684_p6 = scmp.lt.u32.totalorder %s680_s19, %s905_s13 }
 0x61c   :  { %p686_p7 = pnand %p684_p6, %p681_p5 }
 0x61e   :  { %689 = shalt.err (!%p686_p7)
}
 0x61f   :  { %s696_s3 = smov 128   ;;  %s697_s5 = smov 8  }
 0x620   :  { %549 = dma.vmem_to_hbm [thread:$0]  %s544_s4, 256, %s905_s13, [#allocation4], %s696_s3, %s696_s3, %s697_s5  }
 0x621   :  { %690 = dma.done.wait [#allocation4], 256  }
 0x622   :  { %691 = vsyncadd [#allocation4], 4294967040 }
 0x623   :  { %553 = vsyncpa [#allocation4], 1 }

</bundles_post_ra>
